<compile_context>
chip_gen: v7x
topology: tpu7x:2x2x1
jax: 0.10.0
libtpu: 0.0.40
codegen_flags: <defaults>
</compile_context>

<pallas_src>
import functools

import jax
import jax.numpy as jnp
from jax.experimental import pallas as pl
from jax.experimental.pallas import tpu as pltpu


def lstm_fc_kernel(x2d_ref, wih0_ref, whh0_ref, b0_ref,
                   w1_ref, b1_ref, wfc_ref, bfc_ref, y_ref,
                   *, seq, batch):
    H = whh0_ref.shape[0]

    whh0 = whh0_ref[...]          # (H, 4H)   (g-cols pre-scaled by 2)
    w1 = w1_ref[...]              # (2H, 4H)  stacked [Whh1; Wih1]
    b1 = b1_ref[...]              # (1, 4H)

    # Hoisted layer-0 input projection + bias: off the recurrent critical
    # path, single MXU op for all timesteps.
    xproj = (jnp.dot(x2d_ref[...], wih0_ref[...],
                     preferred_element_type=jnp.float32)
             + b0_ref[...])                                  # (seq*batch, 4H)

    h0 = jnp.zeros((batch, H), jnp.float32)
    c0 = jnp.zeros((batch, H), jnp.float32)
    h1 = jnp.zeros((batch, H), jnp.float32)
    c1 = jnp.zeros((batch, H), jnp.float32)

    def gates(g, c):
        # One lane-full sigmoid over all 4 gates (single EUP launch), then
        # recover tanh for the cell-candidate gate on the VPU:
        # tanh(x) = 2*sigmoid(2x) - 1 (its preactivation was pre-doubled).
        s = jax.nn.sigmoid(g)
        i = s[:, 0:H]
        f = s[:, H:2 * H]
        tg = 2.0 * s[:, 2 * H:3 * H] - 1.0
        o = s[:, 3 * H:4 * H]
        c_new = f * c + i * tg
        h_new = o * jnp.tanh(c_new)
        return h_new, c_new

    # seq is small and static -> unrolled Python loop (lets the scheduler
    # overlap layer1(t) with layer0(t+1)).
    outs = []
    for t in range(seq):
        # Layer 0: only the recurrent matmul stays on the serial path.
        g0 = (xproj[t * batch:(t + 1) * batch, :]
              + jnp.dot(h0, whh0, preferred_element_type=jnp.float32))
        h0, c0 = gates(g0, c0)

        # Layer 1: single fused (batch, 2H) @ (2H, 4H) matmul.
        g1 = (jnp.dot(jnp.concatenate([h1, h0], axis=1), w1,
                      preferred_element_type=jnp.float32) + b1)
        h1, c1 = gates(g1, c1)
        outs.append(h1)

    # Deferred FC: one (batch, seq*H) @ (seq*H, n_classes) matmul after the
    # recurrence (matches PyTorch's out.reshape(batch, -1) flattening order).
    flat = jnp.concatenate(outs, axis=1)                     # (batch, seq*H)
    y_ref[...] = (jnp.dot(flat, wfc_ref[...],
                          preferred_element_type=jnp.float32) + bfc_ref[...])


def prepare_params(params):
    """One-time parameter prep: transpose, fuse biases, stack layer-1 weights,
    and pre-scale the g-gate columns by 2 (for the tanh-via-sigmoid trick)."""
    H = params["whh0"].shape[1]
    gscale = jnp.concatenate([jnp.ones((2 * H,), jnp.float32),
                              2.0 * jnp.ones((H,), jnp.float32),
                              jnp.ones((H,), jnp.float32)])
    wih0p = params["wih0"].T.astype(jnp.float32) * gscale          # (in, 4H)
    whh0p = params["whh0"].T.astype(jnp.float32) * gscale          # (H, 4H)
    b0p = ((params["bih0"] + params["bhh0"]) * gscale).reshape(1, -1)
    w1p = (jnp.concatenate([params["whh1"].T, params["wih1"].T], axis=0)
           .astype(jnp.float32) * gscale)                          # (2H, 4H)
    b1p = ((params["bih1"] + params["bhh1"]) * gscale).reshape(1, -1)
    wfcT = params["wfc"].T.astype(jnp.float32)                     # (seq*H, C)
    bfc = params["bfc"].reshape(1, -1).astype(jnp.float32)         # (1, C)
    return dict(wih0=wih0p, whh0=whh0p, b0=b0p, w1=w1p, b1=b1p,
                wfc=wfcT, bfc=bfc)


def rnn_lstm_forward(x, prepped):
    """x: (batch, seq, input_size) float32 (PyTorch batch_first layout)."""
    batch, seq, in_size = x.shape
    n_classes = prepped["wfc"].shape[1]

    # time-major, then flatten (seq, batch) so the layer-0 input projection is
    # a single matmul inside the kernel.
    x2d = jnp.transpose(x, (1, 0, 2)).reshape(seq * batch, in_size)

    kernel = functools.partial(lstm_fc_kernel, seq=seq, batch=batch)
    vmem = pl.BlockSpec(memory_space=pltpu.MemorySpace.VMEM)
    # TODO(synk): add a batch-parallel grid (dimension_semantics=("parallel",))
    # to use the second v7x TensorCore once batch is large enough to split.
    return pl.pallas_call(
        kernel,
        out_shape=jax.ShapeDtypeStruct((batch, n_classes), jnp.float32),
        in_specs=[vmem] * 8,
        out_specs=vmem,
    )(x2d, prepped["wih0"], prepped["whh0"], prepped["b0"],
      prepped["w1"], prepped["b1"], prepped["wfc"], prepped["bfc"])


def rnn_lstm_reference(x, params):
    """Pure-JAX reference mirroring torch.nn.LSTM + Linear."""
    batch, seq, _ = x.shape
    H = params["whh0"].shape[1]

    def cell(x_t, h, c, wih, whh, bih, bhh):
        g = x_t @ wih.T + bih + h @ whh.T + bhh
        i = jax.nn.sigmoid(g[:, 0:H])
        f = jax.nn.sigmoid(g[:, H:2 * H])
        gg = jnp.tanh(g[:, 2 * H:3 * H])
        o = jax.nn.sigmoid(g[:, 3 * H:4 * H])
        c_new = f * c + i * gg
        return o * jnp.tanh(c_new), c_new

    h0 = c0 = h1 = c1 = jnp.zeros((batch, H), jnp.float32)
    outs = []
    for t in range(seq):
        h0, c0 = cell(x[:, t, :], h0, c0, params["wih0"], params["whh0"],
                      params["bih0"], params["bhh0"])
        h1, c1 = cell(h0, h1, c1, params["wih1"], params["whh1"],
                      params["bih1"], params["bhh1"])
        outs.append(h1)
    out = jnp.stack(outs, axis=1).reshape(batch, seq * H)   # (batch, seq*H)
    return out @ params["wfc"].T + params["bfc"]


if __name__ == "__main__":
    # Small shapes consistent with the module's forward.
    batch, seq, input_size, hidden, n_classes = 2, 8, 1, 32, 1

    key = jax.random.PRNGKey(0)
    ks = jax.random.split(key, 11)
    s = 0.1  # keep gates away from saturation
    params = {
        "wih0": s * jax.random.normal(ks[0], (4 * hidden, input_size), jnp.float32),
        "whh0": s * jax.random.normal(ks[1], (4 * hidden, hidden), jnp.float32),
        "bih0": s * jax.random.normal(ks[2], (4 * hidden,), jnp.float32),
        "bhh0": s * jax.random.normal(ks[3], (4 * hidden,), jnp.float32),
        "wih1": s * jax.random.normal(ks[4], (4 * hidden, hidden), jnp.float32),
        "whh1": s * jax.random.normal(ks[5], (4 * hidden, hidden), jnp.float32),
        "bih1": s * jax.random.normal(ks[6], (4 * hidden,), jnp.float32),
        "bhh1": s * jax.random.normal(ks[7], (4 * hidden,), jnp.float32),
        "wfc": s * jax.random.normal(ks[8], (n_classes, hidden * seq), jnp.float32),
        "bfc": s * jax.random.normal(ks[9], (n_classes,), jnp.float32),
    }
    x = jax.random.normal(ks[10], (batch, seq, input_size), jnp.float32)

    prepped = prepare_params(params)          # one-time param prep
    prepped = jax.tree_util.tree_map(jax.block_until_ready, prepped)

    y = rnn_lstm_forward(x, prepped)
    y = jax.block_until_ready(y)

    y_ref = rnn_lstm_reference(x, params)
    assert y.shape == (batch, n_classes)
    assert jnp.allclose(y, y_ref, atol=1e-4, rtol=1e-4)

    print("KERNEL_OK")
</pallas_src>

<mosaic_0001>
module attributes {stable_mosaic.version = 11 : i64} {
  func.func @lstm_fc_kernel(%arg0: memref<16x1xf32, #tpu.memory_space<vmem>>, %arg1: memref<1x128xf32, #tpu.memory_space<vmem>>, %arg2: memref<32x128xf32, #tpu.memory_space<vmem>>, %arg3: memref<1x128xf32, #tpu.memory_space<vmem>>, %arg4: memref<64x128xf32, #tpu.memory_space<vmem>>, %arg5: memref<1x128xf32, #tpu.memory_space<vmem>>, %arg6: memref<256x1xf32, #tpu.memory_space<vmem>>, %arg7: memref<1x1xf32, #tpu.memory_space<vmem>>, %arg8: memref<2x1xf32, #tpu.memory_space<vmem>>) attributes {dimension_semantics = [], scalar_prefetch = 0 : i64, scratch_operands = 0 : i64, tpu.core_type = #tpu.core_type<tc>} {
    %c0 = arith.constant 0 : index
    %c0_0 = arith.constant 0 : index
    %0 = vector.load %arg2[%c0, %c0_0] : memref<32x128xf32, #tpu.memory_space<vmem>>, vector<32x128xf32>
    %c0_1 = arith.constant 0 : index
    %c0_2 = arith.constant 0 : index
    %1 = vector.load %arg4[%c0_1, %c0_2] : memref<64x128xf32, #tpu.memory_space<vmem>>, vector<64x128xf32>
    %c0_3 = arith.constant 0 : index
    %c0_4 = arith.constant 0 : index
    %2 = vector.load %arg5[%c0_3, %c0_4] : memref<1x128xf32, #tpu.memory_space<vmem>>, vector<1x128xf32>
    %c0_5 = arith.constant 0 : index
    %c0_6 = arith.constant 0 : index
    %3 = vector.load %arg0[%c0_5, %c0_6] : memref<16x1xf32, #tpu.memory_space<vmem>>, vector<16x1xf32>
    %c0_7 = arith.constant 0 : index
    %c0_8 = arith.constant 0 : index
    %4 = vector.load %arg1[%c0_7, %c0_8] : memref<1x128xf32, #tpu.memory_space<vmem>>, vector<1x128xf32>
    %cst = arith.constant dense<0.000000e+00> : vector<16x128xf32>
    %5 = tpu.matmul %3, %4, %cst {dimension_numbers = #tpu.dot_dimension_numbers<[1], [0], [0], [1], [0, 0, 1, 1], [], []>} : vector<16x1xf32>, vector<1x128xf32>, vector<16x128xf32> -> vector<16x128xf32>
    %c0_9 = arith.constant 0 : index
    %c0_10 = arith.constant 0 : index
    %6 = vector.load %arg3[%c0_9, %c0_10] : memref<1x128xf32, #tpu.memory_space<vmem>>, vector<1x128xf32>
    %7 = vector.broadcast %6 : vector<1x128xf32> to vector<16x128xf32>
    %8 = arith.addf %5, %7 : vector<16x128xf32>
    %cst_11 = arith.constant 0.000000e+00 : f32
    %9 = vector.broadcast %cst_11 : f32 to vector<2x32xf32>
    %cst_12 = arith.constant 0.000000e+00 : f32
    %10 = vector.broadcast %cst_12 : f32 to vector<2x32xf32>
    %cst_13 = arith.constant 0.000000e+00 : f32
    %11 = vector.broadcast %cst_13 : f32 to vector<2x32xf32>
    %cst_14 = arith.constant 0.000000e+00 : f32
    %12 = vector.broadcast %cst_14 : f32 to vector<2x32xf32>
    %13 = vector.extract_strided_slice %8 {offsets = [0, 0], sizes = [2, 128], strides = [1, 1]} : vector<16x128xf32> to vector<2x128xf32>
    %cst_15 = arith.constant dense<0.000000e+00> : vector<2x128xf32>
    %14 = tpu.matmul %9, %0, %cst_15 {dimension_numbers = #tpu.dot_dimension_numbers<[1], [0], [0], [1], [0, 0, 1, 1], [], []>} : vector<2x32xf32>, vector<32x128xf32>, vector<2x128xf32> -> vector<2x128xf32>
    %15 = arith.addf %13, %14 : vector<2x128xf32>
    %16 = arith.negf %15 : vector<2x128xf32>
    %17 = math.exp %16 : vector<2x128xf32>
    %cst_16 = arith.constant 1.000000e+00 : f32
    %18 = vector.broadcast %cst_16 : f32 to vector<2x128xf32>
    %19 = arith.addf %18, %17 : vector<2x128xf32>
    %20 = arith.divf %18, %19 : vector<2x128xf32>
    %21 = vector.extract_strided_slice %20 {offsets = [0, 0], sizes = [2, 32], strides = [1, 1]} : vector<2x128xf32> to vector<2x32xf32>
    %22 = vector.extract_strided_slice %20 {offsets = [0, 32], sizes = [2, 32], strides = [1, 1]} : vector<2x128xf32> to vector<2x32xf32>
    %23 = vector.extract_strided_slice %20 {offsets = [0, 64], sizes = [2, 32], strides = [1, 1]} : vector<2x128xf32> to vector<2x32xf32>
    %cst_17 = arith.constant 2.000000e+00 : f32
    %24 = vector.broadcast %cst_17 : f32 to vector<2x32xf32>
    %25 = arith.mulf %24, %23 : vector<2x32xf32>
    %cst_18 = arith.constant 1.000000e+00 : f32
    %26 = vector.broadcast %cst_18 : f32 to vector<2x32xf32>
    %27 = arith.subf %25, %26 : vector<2x32xf32>
    %28 = vector.extract_strided_slice %20 {offsets = [0, 96], sizes = [2, 32], strides = [1, 1]} : vector<2x128xf32> to vector<2x32xf32>
    %29 = arith.mulf %22, %10 : vector<2x32xf32>
    %30 = arith.mulf %21, %27 : vector<2x32xf32>
    %31 = arith.addf %29, %30 : vector<2x32xf32>
    %32 = math.tanh %31 : vector<2x32xf32>
    %33 = arith.mulf %28, %32 : vector<2x32xf32>
    %34 = tpu.concatenate %11, %33 in 1 : vector<2x32xf32>, vector<2x32xf32> -> vector<2x64xf32>
    %cst_19 = arith.constant dense<0.000000e+00> : vector<2x128xf32>
    %35 = tpu.matmul %34, %1, %cst_19 {dimension_numbers = #tpu.dot_dimension_numbers<[1], [0], [0], [1], [0, 0, 1, 1], [], []>} : vector<2x64xf32>, vector<64x128xf32>, vector<2x128xf32> -> vector<2x128xf32>
    %36 = vector.broadcast %2 : vector<1x128xf32> to vector<2x128xf32>
    %37 = arith.addf %35, %36 : vector<2x128xf32>
    %38 = arith.negf %37 : vector<2x128xf32>
    %39 = math.exp %38 : vector<2x128xf32>
    %cst_20 = arith.constant 1.000000e+00 : f32
    %40 = vector.broadcast %cst_20 : f32 to vector<2x128xf32>
    %41 = arith.addf %40, %39 : vector<2x128xf32>
    %42 = arith.divf %40, %41 : vector<2x128xf32>
    %43 = vector.extract_strided_slice %42 {offsets = [0, 0], sizes = [2, 32], strides = [1, 1]} : vector<2x128xf32> to vector<2x32xf32>
    %44 = vector.extract_strided_slice %42 {offsets = [0, 32], sizes = [2, 32], strides = [1, 1]} : vector<2x128xf32> to vector<2x32xf32>
    %45 = vector.extract_strided_slice %42 {offsets = [0, 64], sizes = [2, 32], strides = [1, 1]} : vector<2x128xf32> to vector<2x32xf32>
    %cst_21 = arith.constant 2.000000e+00 : f32
    %46 = vector.broadcast %cst_21 : f32 to vector<2x32xf32>
    %47 = arith.mulf %46, %45 : vector<2x32xf32>
    %cst_22 = arith.constant 1.000000e+00 : f32
    %48 = vector.broadcast %cst_22 : f32 to vector<2x32xf32>
    %49 = arith.subf %47, %48 : vector<2x32xf32>
    %50 = vector.extract_strided_slice %42 {offsets = [0, 96], sizes = [2, 32], strides = [1, 1]} : vector<2x128xf32> to vector<2x32xf32>
    %51 = arith.mulf %44, %12 : vector<2x32xf32>
    %52 = arith.mulf %43, %49 : vector<2x32xf32>
    %53 = arith.addf %51, %52 : vector<2x32xf32>
    %54 = math.tanh %53 : vector<2x32xf32>
    %55 = arith.mulf %50, %54 : vector<2x32xf32>
    %56 = vector.extract_strided_slice %8 {offsets = [2, 0], sizes = [2, 128], strides = [1, 1]} : vector<16x128xf32> to vector<2x128xf32>
    %cst_23 = arith.constant dense<0.000000e+00> : vector<2x128xf32>
    %57 = tpu.matmul %33, %0, %cst_23 {dimension_numbers = #tpu.dot_dimension_numbers<[1], [0], [0], [1], [0, 0, 1, 1], [], []>} : vector<2x32xf32>, vector<32x128xf32>, vector<2x128xf32> -> vector<2x128xf32>
    %58 = arith.addf %56, %57 : vector<2x128xf32>
    %59 = arith.negf %58 : vector<2x128xf32>
    %60 = math.exp %59 : vector<2x128xf32>
    %cst_24 = arith.constant 1.000000e+00 : f32
    %61 = vector.broadcast %cst_24 : f32 to vector<2x128xf32>
    %62 = arith.addf %61, %60 : vector<2x128xf32>
    %63 = arith.divf %61, %62 : vector<2x128xf32>
    %64 = vector.extract_strided_slice %63 {offsets = [0, 0], sizes = [2, 32], strides = [1, 1]} : vector<2x128xf32> to vector<2x32xf32>
    %65 = vector.extract_strided_slice %63 {offsets = [0, 32], sizes = [2, 32], strides = [1, 1]} : vector<2x128xf32> to vector<2x32xf32>
    %66 = vector.extract_strided_slice %63 {offsets = [0, 64], sizes = [2, 32], strides = [1, 1]} : vector<2x128xf32> to vector<2x32xf32>
    %cst_25 = arith.constant 2.000000e+00 : f32
    %67 = vector.broadcast %cst_25 : f32 to vector<2x32xf32>
    %68 = arith.mulf %67, %66 : vector<2x32xf32>
    %cst_26 = arith.constant 1.000000e+00 : f32
    %69 = vector.broadcast %cst_26 : f32 to vector<2x32xf32>
    %70 = arith.subf %68, %69 : vector<2x32xf32>
    %71 = vector.extract_strided_slice %63 {offsets = [0, 96], sizes = [2, 32], strides = [1, 1]} : vector<2x128xf32> to vector<2x32xf32>
    %72 = arith.mulf %65, %31 : vector<2x32xf32>
    %73 = arith.mulf %64, %70 : vector<2x32xf32>
    %74 = arith.addf %72, %73 : vector<2x32xf32>
    %75 = math.tanh %74 : vector<2x32xf32>
    %76 = arith.mulf %71, %75 : vector<2x32xf32>
    %77 = tpu.concatenate %55, %76 in 1 : vector<2x32xf32>, vector<2x32xf32> -> vector<2x64xf32>
    %cst_27 = arith.constant dense<0.000000e+00> : vector<2x128xf32>
    %78 = tpu.matmul %77, %1, %cst_27 {dimension_numbers = #tpu.dot_dimension_numbers<[1], [0], [0], [1], [0, 0, 1, 1], [], []>} : vector<2x64xf32>, vector<64x128xf32>, vector<2x128xf32> -> vector<2x128xf32>
    %79 = vector.broadcast %2 : vector<1x128xf32> to vector<2x128xf32>
    %80 = arith.addf %78, %79 : vector<2x128xf32>
    %81 = arith.negf %80 : vector<2x128xf32>
    %82 = math.exp %81 : vector<2x128xf32>
    %cst_28 = arith.constant 1.000000e+00 : f32
    %83 = vector.broadcast %cst_28 : f32 to vector<2x128xf32>
    %84 = arith.addf %83, %82 : vector<2x128xf32>
    %85 = arith.divf %83, %84 : vector<2x128xf32>
    %86 = vector.extract_strided_slice %85 {offsets = [0, 0], sizes = [2, 32], strides = [1, 1]} : vector<2x128xf32> to vector<2x32xf32>
    %87 = vector.extract_strided_slice %85 {offsets = [0, 32], sizes = [2, 32], strides = [1, 1]} : vector<2x128xf32> to vector<2x32xf32>
    %88 = vector.extract_strided_slice %85 {offsets = [0, 64], sizes = [2, 32], strides = [1, 1]} : vector<2x128xf32> to vector<2x32xf32>
    %cst_29 = arith.constant 2.000000e+00 : f32
    %89 = vector.broadcast %cst_29 : f32 to vector<2x32xf32>
    %90 = arith.mulf %89, %88 : vector<2x32xf32>
    %cst_30 = arith.constant 1.000000e+00 : f32
    %91 = vector.broadcast %cst_30 : f32 to vector<2x32xf32>
    %92 = arith.subf %90, %91 : vector<2x32xf32>
    %93 = vector.extract_strided_slice %85 {offsets = [0, 96], sizes = [2, 32], strides = [1, 1]} : vector<2x128xf32> to vector<2x32xf32>
    %94 = arith.mulf %87, %53 : vector<2x32xf32>
    %95 = arith.mulf %86, %92 : vector<2x32xf32>
    %96 = arith.addf %94, %95 : vector<2x32xf32>
    %97 = math.tanh %96 : vector<2x32xf32>
    %98 = arith.mulf %93, %97 : vector<2x32xf32>
    %99 = vector.extract_strided_slice %8 {offsets = [4, 0], sizes = [2, 128], strides = [1, 1]} : vector<16x128xf32> to vector<2x128xf32>
    %cst_31 = arith.constant dense<0.000000e+00> : vector<2x128xf32>
    %100 = tpu.matmul %76, %0, %cst_31 {dimension_numbers = #tpu.dot_dimension_numbers<[1], [0], [0], [1], [0, 0, 1, 1], [], []>} : vector<2x32xf32>, vector<32x128xf32>, vector<2x128xf32> -> vector<2x128xf32>
    %101 = arith.addf %99, %100 : vector<2x128xf32>
    %102 = arith.negf %101 : vector<2x128xf32>
    %103 = math.exp %102 : vector<2x128xf32>
    %cst_32 = arith.constant 1.000000e+00 : f32
    %104 = vector.broadcast %cst_32 : f32 to vector<2x128xf32>
    %105 = arith.addf %104, %103 : vector<2x128xf32>
    %106 = arith.divf %104, %105 : vector<2x128xf32>
    %107 = vector.extract_strided_slice %106 {offsets = [0, 0], sizes = [2, 32], strides = [1, 1]} : vector<2x128xf32> to vector<2x32xf32>
    %108 = vector.extract_strided_slice %106 {offsets = [0, 32], sizes = [2, 32], strides = [1, 1]} : vector<2x128xf32> to vector<2x32xf32>
    %109 = vector.extract_strided_slice %106 {offsets = [0, 64], sizes = [2, 32], strides = [1, 1]} : vector<2x128xf32> to vector<2x32xf32>
    %cst_33 = arith.constant 2.000000e+00 : f32
    %110 = vector.broadcast %cst_33 : f32 to vector<2x32xf32>
    %111 = arith.mulf %110, %109 : vector<2x32xf32>
    %cst_34 = arith.constant 1.000000e+00 : f32
    %112 = vector.broadcast %cst_34 : f32 to vector<2x32xf32>
    %113 = arith.subf %111, %112 : vector<2x32xf32>
    %114 = vector.extract_strided_slice %106 {offsets = [0, 96], sizes = [2, 32], strides = [1, 1]} : vector<2x128xf32> to vector<2x32xf32>
    %115 = arith.mulf %108, %74 : vector<2x32xf32>
    %116 = arith.mulf %107, %113 : vector<2x32xf32>
    %117 = arith.addf %115, %116 : vector<2x32xf32>
    %118 = math.tanh %117 : vector<2x32xf32>
    %119 = arith.mulf %114, %118 : vector<2x32xf32>
    %120 = tpu.concatenate %98, %119 in 1 : vector<2x32xf32>, vector<2x32xf32> -> vector<2x64xf32>
    %cst_35 = arith.constant dense<0.000000e+00> : vector<2x128xf32>
    %121 = tpu.matmul %120, %1, %cst_35 {dimension_numbers = #tpu.dot_dimension_numbers<[1], [0], [0], [1], [0, 0, 1, 1], [], []>} : vector<2x64xf32>, vector<64x128xf32>, vector<2x128xf32> -> vector<2x128xf32>
    %122 = vector.broadcast %2 : vector<1x128xf32> to vector<2x128xf32>
    %123 = arith.addf %121, %122 : vector<2x128xf32>
    %124 = arith.negf %123 : vector<2x128xf32>
    %125 = math.exp %124 : vector<2x128xf32>
    %cst_36 = arith.constant 1.000000e+00 : f32
    %126 = vector.broadcast %cst_36 : f32 to vector<2x128xf32>
    %127 = arith.addf %126, %125 : vector<2x128xf32>
    %128 = arith.divf %126, %127 : vector<2x128xf32>
    %129 = vector.extract_strided_slice %128 {offsets = [0, 0], sizes = [2, 32], strides = [1, 1]} : vector<2x128xf32> to vector<2x32xf32>
    %130 = vector.extract_strided_slice %128 {offsets = [0, 32], sizes = [2, 32], strides = [1, 1]} : vector<2x128xf32> to vector<2x32xf32>
    %131 = vector.extract_strided_slice %128 {offsets = [0, 64], sizes = [2, 32], strides = [1, 1]} : vector<2x128xf32> to vector<2x32xf32>
    %cst_37 = arith.constant 2.000000e+00 : f32
    %132 = vector.broadcast %cst_37 : f32 to vector<2x32xf32>
    %133 = arith.mulf %132, %131 : vector<2x32xf32>
    %cst_38 = arith.constant 1.000000e+00 : f32
    %134 = vector.broadcast %cst_38 : f32 to vector<2x32xf32>
    %135 = arith.subf %133, %134 : vector<2x32xf32>
    %136 = vector.extract_strided_slice %128 {offsets = [0, 96], sizes = [2, 32], strides = [1, 1]} : vector<2x128xf32> to vector<2x32xf32>
    %137 = arith.mulf %130, %96 : vector<2x32xf32>
    %138 = arith.mulf %129, %135 : vector<2x32xf32>
    %139 = arith.addf %137, %138 : vector<2x32xf32>
    %140 = math.tanh %139 : vector<2x32xf32>
    %141 = arith.mulf %136, %140 : vector<2x32xf32>
    %142 = vector.extract_strided_slice %8 {offsets = [6, 0], sizes = [2, 128], strides = [1, 1]} : vector<16x128xf32> to vector<2x128xf32>
    %cst_39 = arith.constant dense<0.000000e+00> : vector<2x128xf32>
    %143 = tpu.matmul %119, %0, %cst_39 {dimension_numbers = #tpu.dot_dimension_numbers<[1], [0], [0], [1], [0, 0, 1, 1], [], []>} : vector<2x32xf32>, vector<32x128xf32>, vector<2x128xf32> -> vector<2x128xf32>
    %144 = arith.addf %142, %143 : vector<2x128xf32>
    %145 = arith.negf %144 : vector<2x128xf32>
    %146 = math.exp %145 : vector<2x128xf32>
    %cst_40 = arith.constant 1.000000e+00 : f32
    %147 = vector.broadcast %cst_40 : f32 to vector<2x128xf32>
    %148 = arith.addf %147, %146 : vector<2x128xf32>
    %149 = arith.divf %147, %148 : vector<2x128xf32>
    %150 = vector.extract_strided_slice %149 {offsets = [0, 0], sizes = [2, 32], strides = [1, 1]} : vector<2x128xf32> to vector<2x32xf32>
    %151 = vector.extract_strided_slice %149 {offsets = [0, 32], sizes = [2, 32], strides = [1, 1]} : vector<2x128xf32> to vector<2x32xf32>
    %152 = vector.extract_strided_slice %149 {offsets = [0, 64], sizes = [2, 32], strides = [1, 1]} : vector<2x128xf32> to vector<2x32xf32>
    %cst_41 = arith.constant 2.000000e+00 : f32
    %153 = vector.broadcast %cst_41 : f32 to vector<2x32xf32>
    %154 = arith.mulf %153, %152 : vector<2x32xf32>
    %cst_42 = arith.constant 1.000000e+00 : f32
    %155 = vector.broadcast %cst_42 : f32 to vector<2x32xf32>
    %156 = arith.subf %154, %155 : vector<2x32xf32>
    %157 = vector.extract_strided_slice %149 {offsets = [0, 96], sizes = [2, 32], strides = [1, 1]} : vector<2x128xf32> to vector<2x32xf32>
    %158 = arith.mulf %151, %117 : vector<2x32xf32>
    %159 = arith.mulf %150, %156 : vector<2x32xf32>
    %160 = arith.addf %158, %159 : vector<2x32xf32>
    %161 = math.tanh %160 : vector<2x32xf32>
    %162 = arith.mulf %157, %161 : vector<2x32xf32>
    %163 = tpu.concatenate %141, %162 in 1 : vector<2x32xf32>, vector<2x32xf32> -> vector<2x64xf32>
    %cst_43 = arith.constant dense<0.000000e+00> : vector<2x128xf32>
    %164 = tpu.matmul %163, %1, %cst_43 {dimension_numbers = #tpu.dot_dimension_numbers<[1], [0], [0], [1], [0, 0, 1, 1], [], []>} : vector<2x64xf32>, vector<64x128xf32>, vector<2x128xf32> -> vector<2x128xf32>
    %165 = vector.broadcast %2 : vector<1x128xf32> to vector<2x128xf32>
    %166 = arith.addf %164, %165 : vector<2x128xf32>
    %167 = arith.negf %166 : vector<2x128xf32>
    %168 = math.exp %167 : vector<2x128xf32>
    %cst_44 = arith.constant 1.000000e+00 : f32
    %169 = vector.broadcast %cst_44 : f32 to vector<2x128xf32>
    %170 = arith.addf %169, %168 : vector<2x128xf32>
    %171 = arith.divf %169, %170 : vector<2x128xf32>
    %172 = vector.extract_strided_slice %171 {offsets = [0, 0], sizes = [2, 32], strides = [1, 1]} : vector<2x128xf32> to vector<2x32xf32>
    %173 = vector.extract_strided_slice %171 {offsets = [0, 32], sizes = [2, 32], strides = [1, 1]} : vector<2x128xf32> to vector<2x32xf32>
    %174 = vector.extract_strided_slice %171 {offsets = [0, 64], sizes = [2, 32], strides = [1, 1]} : vector<2x128xf32> to vector<2x32xf32>
    %cst_45 = arith.constant 2.000000e+00 : f32
    %175 = vector.broadcast %cst_45 : f32 to vector<2x32xf32>
    %176 = arith.mulf %175, %174 : vector<2x32xf32>
    %cst_46 = arith.constant 1.000000e+00 : f32
    %177 = vector.broadcast %cst_46 : f32 to vector<2x32xf32>
    %178 = arith.subf %176, %177 : vector<2x32xf32>
    %179 = vector.extract_strided_slice %171 {offsets = [0, 96], sizes = [2, 32], strides = [1, 1]} : vector<2x128xf32> to vector<2x32xf32>
    %180 = arith.mulf %173, %139 : vector<2x32xf32>
    %181 = arith.mulf %172, %178 : vector<2x32xf32>
    %182 = arith.addf %180, %181 : vector<2x32xf32>
    %183 = math.tanh %182 : vector<2x32xf32>
    %184 = arith.mulf %179, %183 : vector<2x32xf32>
    %185 = vector.extract_strided_slice %8 {offsets = [8, 0], sizes = [2, 128], strides = [1, 1]} : vector<16x128xf32> to vector<2x128xf32>
    %cst_47 = arith.constant dense<0.000000e+00> : vector<2x128xf32>
    %186 = tpu.matmul %162, %0, %cst_47 {dimension_numbers = #tpu.dot_dimension_numbers<[1], [0], [0], [1], [0, 0, 1, 1], [], []>} : vector<2x32xf32>, vector<32x128xf32>, vector<2x128xf32> -> vector<2x128xf32>
    %187 = arith.addf %185, %186 : vector<2x128xf32>
    %188 = arith.negf %187 : vector<2x128xf32>
    %189 = math.exp %188 : vector<2x128xf32>
    %cst_48 = arith.constant 1.000000e+00 : f32
    %190 = vector.broadcast %cst_48 : f32 to vector<2x128xf32>
    %191 = arith.addf %190, %189 : vector<2x128xf32>
    %192 = arith.divf %190, %191 : vector<2x128xf32>
    %193 = vector.extract_strided_slice %192 {offsets = [0, 0], sizes = [2, 32], strides = [1, 1]} : vector<2x128xf32> to vector<2x32xf32>
    %194 = vector.extract_strided_slice %192 {offsets = [0, 32], sizes = [2, 32], strides = [1, 1]} : vector<2x128xf32> to vector<2x32xf32>
    %195 = vector.extract_strided_slice %192 {offsets = [0, 64], sizes = [2, 32], strides = [1, 1]} : vector<2x128xf32> to vector<2x32xf32>
    %cst_49 = arith.constant 2.000000e+00 : f32
    %196 = vector.broadcast %cst_49 : f32 to vector<2x32xf32>
    %197 = arith.mulf %196, %195 : vector<2x32xf32>
    %cst_50 = arith.constant 1.000000e+00 : f32
    %198 = vector.broadcast %cst_50 : f32 to vector<2x32xf32>
    %199 = arith.subf %197, %198 : vector<2x32xf32>
    %200 = vector.extract_strided_slice %192 {offsets = [0, 96], sizes = [2, 32], strides = [1, 1]} : vector<2x128xf32> to vector<2x32xf32>
    %201 = arith.mulf %194, %160 : vector<2x32xf32>
    %202 = arith.mulf %193, %199 : vector<2x32xf32>
    %203 = arith.addf %201, %202 : vector<2x32xf32>
    %204 = math.tanh %203 : vector<2x32xf32>
    %205 = arith.mulf %200, %204 : vector<2x32xf32>
    %206 = tpu.concatenate %184, %205 in 1 : vector<2x32xf32>, vector<2x32xf32> -> vector<2x64xf32>
    %cst_51 = arith.constant dense<0.000000e+00> : vector<2x128xf32>
    %207 = tpu.matmul %206, %1, %cst_51 {dimension_numbers = #tpu.dot_dimension_numbers<[1], [0], [0], [1], [0, 0, 1, 1], [], []>} : vector<2x64xf32>, vector<64x128xf32>, vector<2x128xf32> -> vector<2x128xf32>
    %208 = vector.broadcast %2 : vector<1x128xf32> to vector<2x128xf32>
    %209 = arith.addf %207, %208 : vector<2x128xf32>
    %210 = arith.negf %209 : vector<2x128xf32>
    %211 = math.exp %210 : vector<2x128xf32>
    %cst_52 = arith.constant 1.000000e+00 : f32
    %212 = vector.broadcast %cst_52 : f32 to vector<2x128xf32>
    %213 = arith.addf %212, %211 : vector<2x128xf32>
    %214 = arith.divf %212, %213 : vector<2x128xf32>
    %215 = vector.extract_strided_slice %214 {offsets = [0, 0], sizes = [2, 32], strides = [1, 1]} : vector<2x128xf32> to vector<2x32xf32>
    %216 = vector.extract_strided_slice %214 {offsets = [0, 32], sizes = [2, 32], strides = [1, 1]} : vector<2x128xf32> to vector<2x32xf32>
    %217 = vector.extract_strided_slice %214 {offsets = [0, 64], sizes = [2, 32], strides = [1, 1]} : vector<2x128xf32> to vector<2x32xf32>
    %cst_53 = arith.constant 2.000000e+00 : f32
    %218 = vector.broadcast %cst_53 : f32 to vector<2x32xf32>
    %219 = arith.mulf %218, %217 : vector<2x32xf32>
    %cst_54 = arith.constant 1.000000e+00 : f32
    %220 = vector.broadcast %cst_54 : f32 to vector<2x32xf32>
    %221 = arith.subf %219, %220 : vector<2x32xf32>
    %222 = vector.extract_strided_slice %214 {offsets = [0, 96], sizes = [2, 32], strides = [1, 1]} : vector<2x128xf32> to vector<2x32xf32>
    %223 = arith.mulf %216, %182 : vector<2x32xf32>
    %224 = arith.mulf %215, %221 : vector<2x32xf32>
    %225 = arith.addf %223, %224 : vector<2x32xf32>
    %226 = math.tanh %225 : vector<2x32xf32>
    %227 = arith.mulf %222, %226 : vector<2x32xf32>
    %228 = vector.extract_strided_slice %8 {offsets = [10, 0], sizes = [2, 128], strides = [1, 1]} : vector<16x128xf32> to vector<2x128xf32>
    %cst_55 = arith.constant dense<0.000000e+00> : vector<2x128xf32>
    %229 = tpu.matmul %205, %0, %cst_55 {dimension_numbers = #tpu.dot_dimension_numbers<[1], [0], [0], [1], [0, 0, 1, 1], [], []>} : vector<2x32xf32>, vector<32x128xf32>, vector<2x128xf32> -> vector<2x128xf32>
    %230 = arith.addf %228, %229 : vector<2x128xf32>
    %231 = arith.negf %230 : vector<2x128xf32>
    %232 = math.exp %231 : vector<2x128xf32>
    %cst_56 = arith.constant 1.000000e+00 : f32
    %233 = vector.broadcast %cst_56 : f32 to vector<2x128xf32>
    %234 = arith.addf %233, %232 : vector<2x128xf32>
    %235 = arith.divf %233, %234 : vector<2x128xf32>
    %236 = vector.extract_strided_slice %235 {offsets = [0, 0], sizes = [2, 32], strides = [1, 1]} : vector<2x128xf32> to vector<2x32xf32>
    %237 = vector.extract_strided_slice %235 {offsets = [0, 32], sizes = [2, 32], strides = [1, 1]} : vector<2x128xf32> to vector<2x32xf32>
    %238 = vector.extract_strided_slice %235 {offsets = [0, 64], sizes = [2, 32], strides = [1, 1]} : vector<2x128xf32> to vector<2x32xf32>
    %cst_57 = arith.constant 2.000000e+00 : f32
    %239 = vector.broadcast %cst_57 : f32 to vector<2x32xf32>
    %240 = arith.mulf %239, %238 : vector<2x32xf32>
    %cst_58 = arith.constant 1.000000e+00 : f32
    %241 = vector.broadcast %cst_58 : f32 to vector<2x32xf32>
    %242 = arith.subf %240, %241 : vector<2x32xf32>
    %243 = vector.extract_strided_slice %235 {offsets = [0, 96], sizes = [2, 32], strides = [1, 1]} : vector<2x128xf32> to vector<2x32xf32>
    %244 = arith.mulf %237, %203 : vector<2x32xf32>
    %245 = arith.mulf %236, %242 : vector<2x32xf32>
    %246 = arith.addf %244, %245 : vector<2x32xf32>
    %247 = math.tanh %246 : vector<2x32xf32>
    %248 = arith.mulf %243, %247 : vector<2x32xf32>
    %249 = tpu.concatenate %227, %248 in 1 : vector<2x32xf32>, vector<2x32xf32> -> vector<2x64xf32>
    %cst_59 = arith.constant dense<0.000000e+00> : vector<2x128xf32>
    %250 = tpu.matmul %249, %1, %cst_59 {dimension_numbers = #tpu.dot_dimension_numbers<[1], [0], [0], [1], [0, 0, 1, 1], [], []>} : vector<2x64xf32>, vector<64x128xf32>, vector<2x128xf32> -> vector<2x128xf32>
    %251 = vector.broadcast %2 : vector<1x128xf32> to vector<2x128xf32>
    %252 = arith.addf %250, %251 : vector<2x128xf32>
    %253 = arith.negf %252 : vector<2x128xf32>
    %254 = math.exp %253 : vector<2x128xf32>
    %cst_60 = arith.constant 1.000000e+00 : f32
    %255 = vector.broadcast %cst_60 : f32 to vector<2x128xf32>
    %256 = arith.addf %255, %254 : vector<2x128xf32>
    %257 = arith.divf %255, %256 : vector<2x128xf32>
    %258 = vector.extract_strided_slice %257 {offsets = [0, 0], sizes = [2, 32], strides = [1, 1]} : vector<2x128xf32> to vector<2x32xf32>
    %259 = vector.extract_strided_slice %257 {offsets = [0, 32], sizes = [2, 32], strides = [1, 1]} : vector<2x128xf32> to vector<2x32xf32>
    %260 = vector.extract_strided_slice %257 {offsets = [0, 64], sizes = [2, 32], strides = [1, 1]} : vector<2x128xf32> to vector<2x32xf32>
    %cst_61 = arith.constant 2.000000e+00 : f32
    %261 = vector.broadcast %cst_61 : f32 to vector<2x32xf32>
    %262 = arith.mulf %261, %260 : vector<2x32xf32>
    %cst_62 = arith.constant 1.000000e+00 : f32
    %263 = vector.broadcast %cst_62 : f32 to vector<2x32xf32>
    %264 = arith.subf %262, %263 : vector<2x32xf32>
    %265 = vector.extract_strided_slice %257 {offsets = [0, 96], sizes = [2, 32], strides = [1, 1]} : vector<2x128xf32> to vector<2x32xf32>
    %266 = arith.mulf %259, %225 : vector<2x32xf32>
    %267 = arith.mulf %258, %264 : vector<2x32xf32>
    %268 = arith.addf %266, %267 : vector<2x32xf32>
    %269 = math.tanh %268 : vector<2x32xf32>
    %270 = arith.mulf %265, %269 : vector<2x32xf32>
    %271 = vector.extract_strided_slice %8 {offsets = [12, 0], sizes = [2, 128], strides = [1, 1]} : vector<16x128xf32> to vector<2x128xf32>
    %cst_63 = arith.constant dense<0.000000e+00> : vector<2x128xf32>
    %272 = tpu.matmul %248, %0, %cst_63 {dimension_numbers = #tpu.dot_dimension_numbers<[1], [0], [0], [1], [0, 0, 1, 1], [], []>} : vector<2x32xf32>, vector<32x128xf32>, vector<2x128xf32> -> vector<2x128xf32>
    %273 = arith.addf %271, %272 : vector<2x128xf32>
    %274 = arith.negf %273 : vector<2x128xf32>
    %275 = math.exp %274 : vector<2x128xf32>
    %cst_64 = arith.constant 1.000000e+00 : f32
    %276 = vector.broadcast %cst_64 : f32 to vector<2x128xf32>
    %277 = arith.addf %276, %275 : vector<2x128xf32>
    %278 = arith.divf %276, %277 : vector<2x128xf32>
    %279 = vector.extract_strided_slice %278 {offsets = [0, 0], sizes = [2, 32], strides = [1, 1]} : vector<2x128xf32> to vector<2x32xf32>
    %280 = vector.extract_strided_slice %278 {offsets = [0, 32], sizes = [2, 32], strides = [1, 1]} : vector<2x128xf32> to vector<2x32xf32>
    %281 = vector.extract_strided_slice %278 {offsets = [0, 64], sizes = [2, 32], strides = [1, 1]} : vector<2x128xf32> to vector<2x32xf32>
    %cst_65 = arith.constant 2.000000e+00 : f32
    %282 = vector.broadcast %cst_65 : f32 to vector<2x32xf32>
    %283 = arith.mulf %282, %281 : vector<2x32xf32>
    %cst_66 = arith.constant 1.000000e+00 : f32
    %284 = vector.broadcast %cst_66 : f32 to vector<2x32xf32>
    %285 = arith.subf %283, %284 : vector<2x32xf32>
    %286 = vector.extract_strided_slice %278 {offsets = [0, 96], sizes = [2, 32], strides = [1, 1]} : vector<2x128xf32> to vector<2x32xf32>
    %287 = arith.mulf %280, %246 : vector<2x32xf32>
    %288 = arith.mulf %279, %285 : vector<2x32xf32>
    %289 = arith.addf %287, %288 : vector<2x32xf32>
    %290 = math.tanh %289 : vector<2x32xf32>
    %291 = arith.mulf %286, %290 : vector<2x32xf32>
    %292 = tpu.concatenate %270, %291 in 1 : vector<2x32xf32>, vector<2x32xf32> -> vector<2x64xf32>
    %cst_67 = arith.constant dense<0.000000e+00> : vector<2x128xf32>
    %293 = tpu.matmul %292, %1, %cst_67 {dimension_numbers = #tpu.dot_dimension_numbers<[1], [0], [0], [1], [0, 0, 1, 1], [], []>} : vector<2x64xf32>, vector<64x128xf32>, vector<2x128xf32> -> vector<2x128xf32>
    %294 = vector.broadcast %2 : vector<1x128xf32> to vector<2x128xf32>
    %295 = arith.addf %293, %294 : vector<2x128xf32>
    %296 = arith.negf %295 : vector<2x128xf32>
    %297 = math.exp %296 : vector<2x128xf32>
    %cst_68 = arith.constant 1.000000e+00 : f32
    %298 = vector.broadcast %cst_68 : f32 to vector<2x128xf32>
    %299 = arith.addf %298, %297 : vector<2x128xf32>
    %300 = arith.divf %298, %299 : vector<2x128xf32>
    %301 = vector.extract_strided_slice %300 {offsets = [0, 0], sizes = [2, 32], strides = [1, 1]} : vector<2x128xf32> to vector<2x32xf32>
    %302 = vector.extract_strided_slice %300 {offsets = [0, 32], sizes = [2, 32], strides = [1, 1]} : vector<2x128xf32> to vector<2x32xf32>
    %303 = vector.extract_strided_slice %300 {offsets = [0, 64], sizes = [2, 32], strides = [1, 1]} : vector<2x128xf32> to vector<2x32xf32>
    %cst_69 = arith.constant 2.000000e+00 : f32
    %304 = vector.broadcast %cst_69 : f32 to vector<2x32xf32>
    %305 = arith.mulf %304, %303 : vector<2x32xf32>
    %cst_70 = arith.constant 1.000000e+00 : f32
    %306 = vector.broadcast %cst_70 : f32 to vector<2x32xf32>
    %307 = arith.subf %305, %306 : vector<2x32xf32>
    %308 = vector.extract_strided_slice %300 {offsets = [0, 96], sizes = [2, 32], strides = [1, 1]} : vector<2x128xf32> to vector<2x32xf32>
    %309 = arith.mulf %302, %268 : vector<2x32xf32>
    %310 = arith.mulf %301, %307 : vector<2x32xf32>
    %311 = arith.addf %309, %310 : vector<2x32xf32>
    %312 = math.tanh %311 : vector<2x32xf32>
    %313 = arith.mulf %308, %312 : vector<2x32xf32>
    %314 = vector.extract_strided_slice %8 {offsets = [14, 0], sizes = [2, 128], strides = [1, 1]} : vector<16x128xf32> to vector<2x128xf32>
    %cst_71 = arith.constant dense<0.000000e+00> : vector<2x128xf32>
    %315 = tpu.matmul %291, %0, %cst_71 {dimension_numbers = #tpu.dot_dimension_numbers<[1], [0], [0], [1], [0, 0, 1, 1], [], []>} : vector<2x32xf32>, vector<32x128xf32>, vector<2x128xf32> -> vector<2x128xf32>
    %316 = arith.addf %314, %315 : vector<2x128xf32>
    %317 = arith.negf %316 : vector<2x128xf32>
    %318 = math.exp %317 : vector<2x128xf32>
    %cst_72 = arith.constant 1.000000e+00 : f32
    %319 = vector.broadcast %cst_72 : f32 to vector<2x128xf32>
    %320 = arith.addf %319, %318 : vector<2x128xf32>
    %321 = arith.divf %319, %320 : vector<2x128xf32>
    %322 = vector.extract_strided_slice %321 {offsets = [0, 0], sizes = [2, 32], strides = [1, 1]} : vector<2x128xf32> to vector<2x32xf32>
    %323 = vector.extract_strided_slice %321 {offsets = [0, 32], sizes = [2, 32], strides = [1, 1]} : vector<2x128xf32> to vector<2x32xf32>
    %324 = vector.extract_strided_slice %321 {offsets = [0, 64], sizes = [2, 32], strides = [1, 1]} : vector<2x128xf32> to vector<2x32xf32>
    %cst_73 = arith.constant 2.000000e+00 : f32
    %325 = vector.broadcast %cst_73 : f32 to vector<2x32xf32>
    %326 = arith.mulf %325, %324 : vector<2x32xf32>
    %cst_74 = arith.constant 1.000000e+00 : f32
    %327 = vector.broadcast %cst_74 : f32 to vector<2x32xf32>
    %328 = arith.subf %326, %327 : vector<2x32xf32>
    %329 = vector.extract_strided_slice %321 {offsets = [0, 96], sizes = [2, 32], strides = [1, 1]} : vector<2x128xf32> to vector<2x32xf32>
    %330 = arith.mulf %323, %289 : vector<2x32xf32>
    %331 = arith.mulf %322, %328 : vector<2x32xf32>
    %332 = arith.addf %330, %331 : vector<2x32xf32>
    %333 = math.tanh %332 : vector<2x32xf32>
    %334 = arith.mulf %329, %333 : vector<2x32xf32>
    %335 = tpu.concatenate %313, %334 in 1 : vector<2x32xf32>, vector<2x32xf32> -> vector<2x64xf32>
    %cst_75 = arith.constant dense<0.000000e+00> : vector<2x128xf32>
    %336 = tpu.matmul %335, %1, %cst_75 {dimension_numbers = #tpu.dot_dimension_numbers<[1], [0], [0], [1], [0, 0, 1, 1], [], []>} : vector<2x64xf32>, vector<64x128xf32>, vector<2x128xf32> -> vector<2x128xf32>
    %337 = vector.broadcast %2 : vector<1x128xf32> to vector<2x128xf32>
    %338 = arith.addf %336, %337 : vector<2x128xf32>
    %339 = arith.negf %338 : vector<2x128xf32>
    %340 = math.exp %339 : vector<2x128xf32>
    %cst_76 = arith.constant 1.000000e+00 : f32
    %341 = vector.broadcast %cst_76 : f32 to vector<2x128xf32>
    %342 = arith.addf %341, %340 : vector<2x128xf32>
    %343 = arith.divf %341, %342 : vector<2x128xf32>
    %344 = vector.extract_strided_slice %343 {offsets = [0, 0], sizes = [2, 32], strides = [1, 1]} : vector<2x128xf32> to vector<2x32xf32>
    %345 = vector.extract_strided_slice %343 {offsets = [0, 32], sizes = [2, 32], strides = [1, 1]} : vector<2x128xf32> to vector<2x32xf32>
    %346 = vector.extract_strided_slice %343 {offsets = [0, 64], sizes = [2, 32], strides = [1, 1]} : vector<2x128xf32> to vector<2x32xf32>
    %cst_77 = arith.constant 2.000000e+00 : f32
    %347 = vector.broadcast %cst_77 : f32 to vector<2x32xf32>
    %348 = arith.mulf %347, %346 : vector<2x32xf32>
    %cst_78 = arith.constant 1.000000e+00 : f32
    %349 = vector.broadcast %cst_78 : f32 to vector<2x32xf32>
    %350 = arith.subf %348, %349 : vector<2x32xf32>
    %351 = vector.extract_strided_slice %343 {offsets = [0, 96], sizes = [2, 32], strides = [1, 1]} : vector<2x128xf32> to vector<2x32xf32>
    %352 = arith.mulf %345, %311 : vector<2x32xf32>
    %353 = arith.mulf %344, %350 : vector<2x32xf32>
    %354 = arith.addf %352, %353 : vector<2x32xf32>
    %355 = math.tanh %354 : vector<2x32xf32>
    %356 = arith.mulf %351, %355 : vector<2x32xf32>
    %357 = tpu.concatenate %55, %98, %141, %184, %227, %270, %313, %356 in 1 : vector<2x32xf32>, vector<2x32xf32>, vector<2x32xf32>, vector<2x32xf32>, vector<2x32xf32>, vector<2x32xf32>, vector<2x32xf32>, vector<2x32xf32> -> vector<2x256xf32>
    %c0_79 = arith.constant 0 : index
    %c0_80 = arith.constant 0 : index
    %358 = vector.load %arg6[%c0_79, %c0_80] : memref<256x1xf32, #tpu.memory_space<vmem>>, vector<256x1xf32>
    %cst_81 = arith.constant dense<0.000000e+00> : vector<2x1xf32>
    %359 = tpu.matmul %357, %358, %cst_81 {dimension_numbers = #tpu.dot_dimension_numbers<[1], [0], [0], [1], [0, 0, 1, 1], [], []>} : vector<2x256xf32>, vector<256x1xf32>, vector<2x1xf32> -> vector<2x1xf32>
    %c0_82 = arith.constant 0 : index
    %c0_83 = arith.constant 0 : index
    %360 = vector.load %arg7[%c0_82, %c0_83] : memref<1x1xf32, #tpu.memory_space<vmem>>, vector<1x1xf32>
    %361 = vector.broadcast %360 : vector<1x1xf32> to vector<2x1xf32>
    %362 = arith.addf %359, %361 : vector<2x1xf32>
    %c0_84 = arith.constant 0 : index
    %c0_85 = arith.constant 0 : index
    %363 = vector.load %arg8[%c0_84, %c0_85] : memref<2x1xf32, #tpu.memory_space<vmem>>, vector<2x1xf32>
    tpu.vector_store %arg8[%c0_84, %c0_85], %362 {strides = array<i32>} : memref<2x1xf32, #tpu.memory_space<vmem>>, vector<2x1xf32>,
    return
  }
}

</mosaic_0001>

<bundles_post_ra>
// kernel: tpu_custom_call.1
= control target key start
LH: loop header
LB: loop body
LE: loop exit
PB: predicated region body
PF: predicated region fallthrough
CT: control target
= control target key end

     0   :  { %vm61_vm0 = vcmask 1040384   ;;  %vm54_vm1 = vcmask 7168   ;;  %v2714_v0 = vmov 0.0|0.0   ;;  %vm2715_vm2 = vmmov 0   ;;  %s2717_s18 = smov 64   ;;  %s2719_s20 = smov 96   ;;  %s3273_s2 = inlined_call_operand.vmem [shape: f32[32,128], index: 2, kind: input, shape index: {}]   ;;  %s3274_s1 = inlined_call_operand.vmem [shape: f32[1,128], index: 1, kind: input, shape index: {}]   ;;  %s3275_s0 = inlined_call_operand.vmem [shape: f32[16,1], index: 0, kind: input, shape index: {}]   ;;  %s3276_s3 = inlined_call_operand.vmem [shape: f32[1,128], index: 3, kind: input, shape index: {}]   ;;  %s3277_s4 = inlined_call_operand.vmem [shape: f32[64,128], index: 4, kind: input, shape index: {}]   ;;  %s3278_s5 = inlined_call_operand.vmem [shape: f32[1,128], index: 5, kind: input, shape index: {}]   ;;  %s3279_s6 = inlined_call_operand.vmem [shape: f32[256,1], index: 6, kind: input, shape index: {}]   ;;  %s3280_s7 = inlined_call_operand.<no memory space> [shape: f32[1,1], index: 7, kind: input, shape index: {}]   ;;  %s3281_s8 = inlined_call_operand.vmem [shape: f32[2,1], index: 8, kind: output, shape index: {}]  }
   0x1   :  { %2426 = vmatprep.subr.bf16.mxu1 %v2714_v0  ;;  %v31_v1 = vld [vmem:[%s3273_s2] sm:$0xff]  ;;  %v32_v2 = vld [vmem:[%s3273_s2 + $0x8] sm:$0xff]  ;;  %v33_v7 = vld [vmem:[%s3273_s2 + $0x10] sm:$0xff]  ;;  %v2716_v8 = vmov 0.0   ;;  %vm140_vm3 = vcmask 261120   ;;  %vm251_vm4 = vcmask 523264  }
   0x2   :  { %v46_v3 = vld [vmem:[%s3274_s1] sm:$0x1]  ;;  %v2775_v4 = vpack.c.bf16 %v32_v2, %v31_v1  ;;  %v45_v6 = vld [vmem:[%s3275_s0 + $0x8] sm:$0xff]  ;;  %2194 = vmatprep.mubr.msk.f32.mxu1 %vm2715_vm2, %v2716_v8  ;;  %v34_v9 = vld [vmem:[%s3273_s2 + $0x18] sm:$0xff]  ;;  %vm1858_vm5 = vcmask 785408   ;;  %vm1972_vm6 = vcmask 1024  }
   0x3   :  { %2181 = vmatprep.subr.msk.mxu0 %vm61_vm0, %v46_v3  ;;  %v44_v5 = vld [vmem:[%s3275_s0] sm:$0xff]  ;;  %v2796_v10 = vpack.c.bf16 %v34_v9, %v33_v7  ;;  %v36_v31 = vld [vmem:[%s3277_s4 + $0x8] sm:$0xff]  ;;  %v37_v32 = vld [vmem:[%s3277_s4 + $0x10] sm:$0xff] }
   0x4   :  { %2182 = vmatpush3.msk.msra.mxu0 %vm61_vm0, %v46_v3  ;;  %2183 = vmatprep.mubr.msk.f32.mxu0 %vm54_vm1, %v44_v5  ;;  %v1978_v11 = vld [vmem:[%s3276_s3] ss:$0 sm:$0xff]  ;;  %s2718_s3 = smov 32   ;;  %v38_v34 = vld [vmem:[%s3277_s4 + $0x18] sm:$0xff]  ;;  %v40_v37 = vld [vmem:[%s3277_s4 + $0x28] sm:$0xff] }
   0x5   :  { %2428 = vmatpush3.bf16.msra.mxu1 %v2775_v4  ;;  %2184 = vmatmul.mubr.msk.f32.vlgmr.msra.gmra.mrb[0].mxu0 %vm54_vm1, %v45_v6  ;;  %v35_v30 = vld [vmem:[%s3277_s4] sm:$0xff]  ;;  %v2839_v35 = vpack.c.bf16 %v38_v34, %v37_v32  ;;  %v41_v39 = vld [vmem:[%s3277_s4 + $0x30] sm:$0xff]  ;;  %v42_v40 = vld [vmem:[%s3277_s4 + $0x38] sm:$0xff] }
   0x6   :  { %2429 = vmatprep.subr.bf16.mxu1 %v2714_v0  ;;  %2432 = vmatprep.subr.bf16.mxu0 %v2714_v0  ;;  %v2833_v33 = vpack.c.bf16 %v36_v31, %v35_v30  ;;  %v39_v36 = vld [vmem:[%s3277_s4 + $0x20] sm:$0xff]  ;;  %v2860_v42 = vpack.c.bf16 %v42_v40, %v41_v39 }
   0x7   :  { %2213 = vmatprep.mubr.msk.f32.mxu0 %vm2715_vm2, %v2716_v8  ;;  %v2849_v38 = vpack.c.bf16 %v40_v37, %v39_v36  ;;  %v2893_v48 = vld [vmem:[%s3278_s5] ss:$0 sm:$0xff] }
   0x8   :  { %2434 = vmatpush3.bf16.msra.mxu0 %v2833_v33 }
   0x9   :  { %2431 = vmatpush3.bf16.msra.mxu1 %v2796_v10  ;;  %2435 = vmatprep.subr.bf16.mxu0 %v2714_v0 }
   0xa   :  { %2444 = vmatprep.subr.bf16.mxu1 %v2714_v0 }
   0xc   :  { %2195 = vmatmul.mubr.f32.vlgmr.msra.gmra.mrb[0].mxu1 %v2716_v8  ;;  %2437 = vmatpush3.bf16.msra.mxu0 %v2839_v35 }
   0xd   :  { %2446 = vmatpush3.bf16.msra.mxu1 %v2775_v4  ;;  %2224 = vmatprep.mubr.msk.f32.mxu1 %vm2715_vm2, %v2716_v8 }
   0xe   :  { %2447 = vmatprep.subr.bf16.mxu1 %v2714_v0  ;;  %2438 = vmatprep.subr.bf16.mxu0 %v2714_v0 }
  0x10   :  { %2440 = vmatpush3.bf16.msra.mxu0 %v2849_v38 }
  0x11   :  { %2449 = vmatpush3.bf16.msra.mxu1 %v2796_v10  ;;  %2441 = vmatprep.subr.bf16.mxu0 %v2714_v0 }
  0x12   :  { %2450 = vmatprep.subr.bf16.mxu1 %v2714_v0 }
  0x14   :  { %2443 = vmatpush3.bf16.msra.mxu0 %v2860_v42 }
  0x15   :  { %2468 = vmatprep.subr.bf16.mxu0 %v2714_v0 }
  0xd8   :  { %v2185_v12 = vpop.f32.mrb[0].mxu0 }
  0xd9   :  { %v2814_v13 = vadd.f32 %v2185_v12, %v1978_v11  ;;  %v131_v14 = vpop.f32.mrb[1].mxu0 }
  0xda   :  { %v2816_v15 = vadd.f32 %v1978_v11, %v131_v14 }
  0xdf   :  { %v210_v16 = vpop.f32.mrb[0].mxu1 }
  0xe0   :  { %v214_v17 = vadd.f32 %v210_v16, %v2816_v15  ;;  %v2196_v18 = vpop.f32.mrb[1].mxu1 }
  0xe2   :  { %v1982_v19 = vmul.f32 -1.442695, %v214_v17 }
  0xe4   :  { %2618 = vpow2.f32 %v1982_v19 }
  0xee   :  { %v2619_v20 = vpop.eup %2618 }
  0xef   :  { %v218_v21 = vadd.f32 1.0, %v2619_v20 }
  0xf1   :  { %2620 = vrcp.f32 %v218_v21 }
  0xfb   :  { %v2621_v22 = vpop.eup %2620 }
  0xfc   :  { %v221_v23 = vmul.f32 2.0, %v2621_v22  ;;  %v223_v27 = vmul.f32 0.0, %v2621_v22 }
  0xfe   :  { %v1983_v24 = vadd.f32 -1.0, %v221_v23 }
 0x100   :  { %225 = vrot.lane.b32.xlu0 %v1983_v24, %s2717_s18 }
 0x172   :  { %v226_v25 = vpop.permute.xlu0 %225 }
 0x173   :  { %v228_v26 = vmul.f32 %v2621_v22, %v226_v25 }
 0x175   :  { %230 = vrot.lane.b32.xlu0 %v228_v26, %s2718_s3 }
 0x1e7   :  { %v231_v28 = vpop.permute.xlu0 %230 }
 0x1e8   :  { %v2821_v29 = vadd.f32 %v231_v28, %v223_v27 }
 0x1ea   :  { %2622 = vtanh.f32 %v2821_v29  ;;  %v437_v12 = vrot.slane %v2821_v29, 6 }
 0x1f4   :  { %v2623_v41 = vpop.eup %2622 }
 0x1f5   :  { %236 = vrot.lane.b32.xlu1 %v2623_v41, %s2717_s18 }
 0x267   :  { %v237_v43 = vpop.permute.xlu1 %236 }
 0x268   :  { %v239_v44 = vmul.f32 %v2621_v22, %v237_v43 }
 0x26a   :  { %241 = vrot.lane.b32.xlu0 %v239_v44, %s2717_s18  ;;  %350 = vrot.lane.b32.xlu1 %v239_v44, %s2718_s3 }
 0x2dc   :  { %v242_v45 = vpop.permute.xlu0 %241  ;;  %v351_v46 = vpop.permute.xlu1 %350 }
 0x2dd   :  { %v244_v47 = vsel %vm140_vm3, 0.0, %v242_v45  ;;  %2225 = vmatmul.mubr.msk.f32.vlgmr.msra.gmra.mrb[2].mxu1 %vm140_vm3, %v351_v46 }
 0x2de   :  { %2214 = vmatmul.mubr.msk.f32.vlgmr.msra.gmra.mrb[2].mxu0 %vm251_vm4, %v244_v47  ;;  %2452 = vmatpush3.bf16.msra.mxu1 %v2833_v33 }
 0x2df   :  { %2453 = vmatprep.subr.bf16.mxu1 %v2714_v0  ;;  %2243 = vmatprep.mubr.msk.f32.mxu1 %vm2715_vm2, %v2716_v8 }
 0x2e0   :  { %2470 = vmatpush3.bf16.msra.mxu0 %v2833_v33  ;;  %2273 = vmatprep.mubr.msk.f32.mxu0 %vm2715_vm2, %v2716_v8 }
 0x2e1   :  { %2471 = vmatprep.subr.bf16.mxu0 %v2714_v0 }
 0x2e2   :  { %2455 = vmatpush3.bf16.msra.mxu1 %v2839_v35 }
 0x2e3   :  { %2456 = vmatprep.subr.bf16.mxu1 %v2714_v0 }
 0x2e4   :  { %2473 = vmatpush3.bf16.msra.mxu0 %v2839_v35 }
 0x2e5   :  { %2474 = vmatprep.subr.bf16.mxu0 %v2714_v0 }
 0x2e6   :  { %2458 = vmatpush3.bf16.msra.mxu1 %v2849_v38 }
 0x2e7   :  { %2459 = vmatprep.subr.bf16.mxu1 %v2714_v0 }
 0x2e8   :  { %2476 = vmatpush3.bf16.msra.mxu0 %v2849_v38 }
 0x2e9   :  { %2477 = vmatprep.subr.bf16.mxu0 %v2714_v0 }
 0x2ea   :  { %2461 = vmatpush3.bf16.msra.mxu1 %v2860_v42 }
 0x2eb   :  { %2462 = vmatprep.subr.bf16.mxu1 %v2714_v0 }
 0x2ec   :  { %2479 = vmatpush3.bf16.msra.mxu0 %v2860_v42 }
 0x2ed   :  { %2498 = vmatprep.subr.bf16.mxu0 %v2714_v0 }
 0x3b0   :  { %v420_v49 = vpop.f32.mrb[2].mxu1 }
 0x3b1   :  { %v425_v50 = vrot.slane %v420_v49, 6  ;;  %v321_v51 = vpop.f32.mrb[2].mxu0  ;;  %v2226_v52 = vpop.f32.mrb[3].mxu1 }
 0x3b2   :  { %v322_v53 = vadd.f32 %v2893_v48, %v321_v51  ;;  %v2215_v54 = vpop.f32.mrb[3].mxu0 }
 0x3b3   :  { %v427_v55 = vadd.f32 %v425_v50, %v2816_v15 }
 0x3b4   :  { %v1986_v56 = vmul.f32 -1.442695, %v322_v53 }
 0x3b5   :  { %v1989_v57 = vmul.f32 -1.442695, %v427_v55 }
 0x3b6   :  { %2624 = vpow2.f32 %v1986_v56 }
 0x3b7   :  { %2626 = vpow2.f32 %v1989_v57 }
 0x3c0   :  { %v2625_v58 = vpop.eup %2624 }
 0x3c1   :  { %v2627_v59 = vpop.eup %2626  ;;  %v328_v60 = vadd.f32 1.0, %v2625_v58 }
 0x3c2   :  { %v431_v61 = vadd.f32 1.0, %v2627_v59 }
 0x3c3   :  { %2628 = vrcp.f32 %v328_v60 }
 0x3c4   :  { %2630 = vrcp.f32 %v431_v61 }
 0x3cd   :  { %v2629_v62 = vpop.eup %2628 }
 0x3ce   :  { %v2631_v63 = vpop.eup %2630  ;;  %v331_v1 = vmul.f32 2.0, %v2629_v62  ;;  %v333_v14 = vmul.f32 0.0, %v2629_v62 }
 0x3cf   :  { %v434_v2 = vmul.f32 2.0, %v2631_v63  ;;  %v439_v17 = vmul.f32 %v2631_v63, %v437_v12 }
 0x3d0   :  { %v1987_v3 = vadd.f32 -1.0, %v331_v1 }
 0x3d1   :  { %v1990_v5 = vadd.f32 -1.0, %v434_v2 }
 0x3d2   :  { %335 = vrot.lane.b32.xlu0 %v1987_v3, %s2717_s18 }
 0x3d3   :  { %441 = vrot.lane.b32.xlu1 %v1990_v5, %s2717_s18 }
 0x444   :  { %v336_v6 = vpop.permute.xlu0 %335 }
 0x445   :  { %v338_v7 = vmul.f32 %v2629_v62, %v336_v6  ;;  %v442_v9 = vpop.permute.xlu1 %441 }
 0x446   :  { %v444_v11 = vmul.f32 %v2631_v63, %v442_v9 }
 0x447   :  { %340 = vrot.lane.b32.xlu0 %v338_v7, %s2718_s3 }
 0x448   :  { %446 = vrot.lane.b32.xlu1 %v444_v11, %s2718_s3 }
 0x4b9   :  { %v341_v16 = vpop.permute.xlu0 %340 }
 0x4ba   :  { %v2902_v18 = vadd.f32 %v341_v16, %v333_v14  ;;  %v447_v19 = vpop.permute.xlu1 %446 }
 0x4bb   :  { %v2904_v20 = vadd.f32 %v447_v19, %v439_v17 }
 0x4bc   :  { %2632 = vtanh.f32 %v2902_v18 }
 0x4bd   :  { %2634 = vtanh.f32 %v2904_v20 }
 0x4c6   :  { %v2633_v21 = vpop.eup %2632 }
 0x4c7   :  { %v2635_v22 = vpop.eup %2634  ;;  %346 = vrot.lane.b32.xlu0 %v2633_v21, %s2717_s18 }
 0x4c8   :  { %452 = vrot.lane.b32.xlu1 %v2635_v22, %s2717_s18 }
 0x539   :  { %v347_v23 = vpop.permute.xlu0 %346 }
 0x53a   :  { %v349_v24 = vmul.f32 %v2629_v62, %v347_v23  ;;  %v453_v25 = vpop.permute.xlu1 %452 }
 0x53b   :  { %v455_v26 = vmul.f32 %v2631_v63, %v453_v25  ;;  %v651_v63 = vrot.slane %v2904_v20, 6 }
 0x53c   :  { %457 = vrot.lane.b32.xlu1 %v349_v24, %s2718_s3 }
 0x53d   :  { %v461_v27 = vrot.slane %v455_v26, 2 }
 0x53f   :  { %462 = vrot.lane.b32.xlu0 %v461_v27, %s2717_s18 }
 0x540   :  { %564 = vrot.lane.b32.xlu1 %v461_v27, %s2718_s3 }
 0x5ae   :  { %v2913_v28 = vpop.permute.xlu1 %457 }
 0x5b1   :  { %v463_v29 = vpop.permute.xlu0 %462 }
 0x5b2   :  { %v465_v30 = vsel %vm140_vm3, %v2913_v28, %v463_v29  ;;  %v565_v31 = vpop.permute.xlu1 %564 }
 0x5b3   :  { %2244 = vmatmul.mubr.msk.f32.vlgmr.msra.gmra.mrb[4].mxu1 %vm251_vm4, %v465_v30 }
 0x5b4   :  { %2464 = vmatpush3.bf16.msra.mxu1 %v2775_v4  ;;  %2254 = vmatprep.mubr.msk.f32.mxu1 %vm2715_vm2, %v2716_v8 }
 0x5b5   :  { %2465 = vmatprep.subr.bf16.mxu1 %v2714_v0 }
 0x5b8   :  { %2467 = vmatpush3.bf16.msra.mxu1 %v2796_v10 }
 0x5b9   :  { %2480 = vmatprep.subr.bf16.mxu1 %v2714_v0 }
 0x5bb   :  { %2255 = vmatmul.mubr.msk.f32.vlgmr.msra.gmra.mrb[6].mxu1 %vm140_vm3, %v565_v31 }
 0x5bc   :  { %2482 = vmatpush3.bf16.msra.mxu1 %v2775_v4  ;;  %2284 = vmatprep.mubr.msk.f32.mxu1 %vm2715_vm2, %v2716_v8 }
 0x5bd   :  { %2483 = vmatprep.subr.bf16.mxu1 %v2714_v0 }
 0x5c0   :  { %2485 = vmatpush3.bf16.msra.mxu1 %v2796_v10 }
 0x5c1   :  { %2486 = vmatprep.subr.bf16.mxu1 %v2714_v0 }
 0x686   :  { %v535_v32 = vpop.f32.mrb[4].mxu1 }
 0x687   :  { %v536_v34 = vadd.f32 %v2893_v48, %v535_v32  ;;  %v2245_v36 = vpop.f32.mrb[5].mxu1 }
 0x689   :  { %v1992_v37 = vmul.f32 -1.442695, %v536_v34 }
 0x68b   :  { %2636 = vpow2.f32 %v1992_v37 }
 0x68e   :  { %v634_v39 = vpop.f32.mrb[6].mxu1 }
 0x68f   :  { %v639_v40 = vrot.slane %v634_v39, 4  ;;  %v2256_v41 = vpop.f32.mrb[7].mxu1 }
 0x691   :  { %v641_v43 = vadd.f32 %v639_v40, %v2816_v15 }
 0x693   :  { %v1995_v44 = vmul.f32 -1.442695, %v641_v43 }
 0x695   :  { %v2637_v45 = vpop.eup %2636  ;;  %2638 = vpow2.f32 %v1995_v44 }
 0x696   :  { %v542_v46 = vadd.f32 1.0, %v2637_v45 }
 0x698   :  { %2640 = vrcp.f32 %v542_v46 }
 0x69f   :  { %v2639_v47 = vpop.eup %2638 }
 0x6a0   :  { %v645_v49 = vadd.f32 1.0, %v2639_v47 }
 0x6a2   :  { %v2641_v50 = vpop.eup %2640  ;;  %2642 = vrcp.f32 %v645_v49 }
 0x6a3   :  { %v545_v51 = vmul.f32 2.0, %v2641_v50  ;;  %v547_v60 = vmul.f32 %v2641_v50, %v2902_v18 }
 0x6a5   :  { %v1993_v52 = vadd.f32 -1.0, %v545_v51 }
 0x6a7   :  { %549 = vrot.lane.b32.xlu1 %v1993_v52, %s2717_s18 }
 0x6ac   :  { %v2643_v53 = vpop.eup %2642 }
 0x6ad   :  { %v648_v54 = vmul.f32 2.0, %v2643_v53  ;;  %v653_v1 = vmul.f32 %v2643_v53, %v651_v63 }
 0x6af   :  { %v1996_v55 = vadd.f32 -1.0, %v648_v54 }
 0x6b1   :  { %655 = vrot.lane.b32.xlu0 %v1996_v55, %s2717_s18 }
 0x719   :  { %v550_v56 = vpop.permute.xlu1 %549 }
 0x71a   :  { %v552_v57 = vmul.f32 %v2641_v50, %v550_v56 }
 0x71c   :  { %554 = vrot.lane.b32.xlu1 %v552_v57, %s2718_s3 }
 0x723   :  { %v656_v58 = vpop.permute.xlu0 %655 }
 0x724   :  { %v658_v59 = vmul.f32 %v2643_v53, %v656_v58 }
 0x726   :  { %660 = vrot.lane.b32.xlu0 %v658_v59, %s2718_s3 }
 0x78e   :  { %v555_v61 = vpop.permute.xlu1 %554 }
 0x78f   :  { %v2938_v62 = vadd.f32 %v555_v61, %v547_v60 }
 0x791   :  { %2644 = vtanh.f32 %v2938_v62 }
 0x798   :  { %v661_v2 = vpop.permute.xlu0 %660 }
 0x799   :  { %v2942_v3 = vadd.f32 %v661_v2, %v653_v1 }
 0x79b   :  { %v2645_v5 = vpop.eup %2644  ;;  %2646 = vtanh.f32 %v2942_v3  ;;  %v865_v47 = vrot.slane %v2942_v3, 6 }
 0x79c   :  { %560 = vrot.lane.b32.xlu1 %v2645_v5, %s2717_s18 }
 0x7a5   :  { %v2647_v6 = vpop.eup %2646 }
 0x7a6   :  { %666 = vrot.lane.b32.xlu0 %v2647_v6, %s2717_s18 }
 0x80e   :  { %v561_v7 = vpop.permute.xlu1 %560 }
 0x80f   :  { %v2947_v9 = vmul.f32 %v2641_v50, %v561_v7 }
 0x811   :  { %671 = vrot.lane.b32.xlu1 %v2947_v9, %s2718_s3 }
 0x818   :  { %v667_v11 = vpop.permute.xlu0 %666 }
 0x819   :  { %v669_v12 = vmul.f32 %v2643_v53, %v667_v11 }
 0x81b   :  { %v675_v14 = vrot.slane %v669_v12, 4 }
 0x81d   :  { %778 = vrot.lane.b32.xlu0 %v675_v14, %s2718_s3 }
 0x821   :  { %676 = vrot.lane.b32.xlu0 %v675_v14, %s2717_s18 }
 0x883   :  { %v672_v17 = vpop.permute.xlu1 %671 }
 0x88f   :  { %v779_v16 = vpop.permute.xlu0 %778 }
 0x890   :  { %2285 = vmatmul.mubr.msk.f32.vlgmr.msra.gmra.mrb[8].mxu1 %vm140_vm3, %v779_v16 }
 0x891   :  { %2488 = vmatpush3.bf16.msra.mxu1 %v2833_v33  ;;  %2303 = vmatprep.mubr.msk.f32.mxu1 %vm2715_vm2, %v2716_v8 }
 0x892   :  { %2489 = vmatprep.subr.bf16.mxu1 %v2714_v0 }
 0x893   :  { %v677_v18 = vpop.permute.xlu0 %676 }
 0x894   :  { %v679_v19 = vsel %vm140_vm3, %v672_v17, %v677_v18 }
 0x895   :  { %2274 = vmatmul.mubr.msk.f32.vlgmr.msra.gmra.mrb[4].mxu0 %vm251_vm4, %v679_v19  ;;  %2491 = vmatpush3.bf16.msra.mxu1 %v2839_v35 }
 0x896   :  { %2500 = vmatpush3.bf16.msra.mxu0 %v2775_v4  ;;  %2492 = vmatprep.subr.bf16.mxu1 %v2714_v0 }
 0x897   :  { %2501 = vmatprep.subr.bf16.mxu0 %v2714_v0  ;;  %2314 = vmatprep.mubr.msk.f32.mxu0 %vm2715_vm2, %v2716_v8 }
 0x899   :  { %2494 = vmatpush3.bf16.msra.mxu1 %v2849_v38 }
 0x89a   :  { %2503 = vmatpush3.bf16.msra.mxu0 %v2796_v10  ;;  %2495 = vmatprep.subr.bf16.mxu1 %v2714_v0 }
 0x89b   :  { %2504 = vmatprep.subr.bf16.mxu0 %v2714_v0 }
 0x89d   :  { %2497 = vmatpush3.bf16.msra.mxu1 %v2860_v42 }
 0x89e   :  { %2516 = vmatprep.subr.bf16.mxu1 %v2714_v0 }
 0x963   :  { %v848_v20 = vpop.f32.mrb[8].mxu1 }
 0x964   :  { %v853_v21 = vrot.slane %v848_v20, 2  ;;  %v2286_v22 = vpop.f32.mrb[9].mxu1 }
 0x966   :  { %v855_v23 = vadd.f32 %v853_v21, %v2816_v15 }
 0x968   :  { %v2001_v24 = vmul.f32 -1.442695, %v855_v23  ;;  %v749_v25 = vpop.f32.mrb[4].mxu0 }
 0x969   :  { %v750_v26 = vadd.f32 %v2893_v48, %v749_v25  ;;  %v2275_v27 = vpop.f32.mrb[5].mxu0 }
 0x96a   :  { %2648 = vpow2.f32 %v2001_v24 }
 0x96b   :  { %v1998_v29 = vmul.f32 -1.442695, %v750_v26 }
 0x96d   :  { %2650 = vpow2.f32 %v1998_v29 }
 0x974   :  { %v2649_v30 = vpop.eup %2648 }
 0x975   :  { %v859_v31 = vadd.f32 1.0, %v2649_v30 }
 0x977   :  { %v2651_v32 = vpop.eup %2650  ;;  %2652 = vrcp.f32 %v859_v31 }
 0x978   :  { %v756_v34 = vadd.f32 1.0, %v2651_v32 }
 0x97a   :  { %2654 = vrcp.f32 %v756_v34 }
 0x981   :  { %v2653_v36 = vpop.eup %2652 }
 0x982   :  { %v862_v37 = vmul.f32 2.0, %v2653_v36  ;;  %v867_v49 = vmul.f32 %v2653_v36, %v865_v47 }
 0x984   :  { %v2655_v39 = vpop.eup %2654  ;;  %v2002_v40 = vadd.f32 -1.0, %v862_v37 }
 0x985   :  { %v759_v41 = vmul.f32 2.0, %v2655_v39  ;;  %v761_v52 = vmul.f32 %v2655_v39, %v2938_v62 }
 0x986   :  { %869 = vrot.lane.b32.xlu1 %v2002_v40, %s2717_s18 }
 0x987   :  { %v1999_v15 = vadd.f32 -1.0, %v759_v41 }
 0x989   :  { %763 = vrot.lane.b32.xlu0 %v1999_v15, %s2717_s18 }
 0x9f8   :  { %v870_v43 = vpop.permute.xlu1 %869 }
 0x9f9   :  { %v872_v44 = vmul.f32 %v2653_v36, %v870_v43 }
 0x9fb   :  { %v764_v45 = vpop.permute.xlu0 %763  ;;  %874 = vrot.lane.b32.xlu1 %v872_v44, %s2718_s3 }
 0x9fc   :  { %v766_v46 = vmul.f32 %v2655_v39, %v764_v45 }
 0x9fe   :  { %768 = vrot.lane.b32.xlu0 %v766_v46, %s2718_s3 }
 0xa6d   :  { %v875_v50 = vpop.permute.xlu1 %874 }
 0xa6e   :  { %v2979_v51 = vadd.f32 %v875_v50, %v867_v49 }
 0xa70   :  { %2656 = vtanh.f32 %v2979_v51  ;;  %v769_v53 = vpop.permute.xlu0 %768  ;;  %v1076_v32 = vrot.slane %v2979_v51, 6 }
 0xa71   :  { %v2983_v54 = vadd.f32 %v769_v53, %v761_v52 }
 0xa73   :  { %2658 = vtanh.f32 %v2983_v54 }
 0xa7a   :  { %v2657_v55 = vpop.eup %2656 }
 0xa7b   :  { %880 = vrot.lane.b32.xlu1 %v2657_v55, %s2717_s18 }
 0xa7d   :  { %v2659_v56 = vpop.eup %2658 }
 0xa7e   :  { %774 = vrot.lane.b32.xlu0 %v2659_v56, %s2717_s18 }
 0xaed   :  { %v881_v57 = vpop.permute.xlu1 %880 }
 0xaee   :  { %v883_v58 = vmul.f32 %v2653_v36, %v881_v57 }
 0xaf0   :  { %v889_v59 = vrot.slane %v883_v58, 6  ;;  %v775_v60 = vpop.permute.xlu0 %774 }
 0xaf1   :  { %v2988_v61 = vmul.f32 %v2655_v39, %v775_v60 }
 0xaf2   :  { %992 = vrot.lane.b32.xlu1 %v889_v59, %s2718_s3 }
 0xaf3   :  { %885 = vrot.lane.b32.xlu0 %v2988_v61, %s2718_s3 }
 0xaf6   :  { %890 = vrot.lane.b32.xlu1 %v889_v59, %s2717_s18 }
 0xb64   :  { %v993_v62 = vpop.permute.xlu1 %992 }
 0xb65   :  { %2315 = vmatmul.mubr.msk.f32.vlgmr.msra.gmra.mrb[6].mxu0 %vm140_vm3, %v993_v62  ;;  %v886_v63 = vpop.permute.xlu0 %885 }
 0xb66   :  { %2506 = vmatpush3.bf16.msra.mxu0 %v2833_v33  ;;  %2333 = vmatprep.mubr.msk.f32.mxu0 %vm2715_vm2, %v2716_v8 }
 0xb67   :  { %2507 = vmatprep.subr.bf16.mxu0 %v2714_v0 }
 0xb68   :  { %v891_v1 = vpop.permute.xlu1 %890 }
 0xb69   :  { %v893_v2 = vsel %vm140_vm3, %v886_v63, %v891_v1 }
 0xb6a   :  { %2304 = vmatmul.mubr.msk.f32.vlgmr.msra.gmra.mrb[10].mxu1 %vm251_vm4, %v893_v2  ;;  %2509 = vmatpush3.bf16.msra.mxu0 %v2839_v35 }
 0xb6b   :  { %2518 = vmatpush3.bf16.msra.mxu1 %v2775_v4  ;;  %2510 = vmatprep.subr.bf16.mxu0 %v2714_v0 }
 0xb6c   :  { %2519 = vmatprep.subr.bf16.mxu1 %v2714_v0  ;;  %2344 = vmatprep.mubr.msk.f32.mxu1 %vm2715_vm2, %v2716_v8 }
 0xb6e   :  { %2512 = vmatpush3.bf16.msra.mxu0 %v2849_v38 }
 0xb6f   :  { %2521 = vmatpush3.bf16.msra.mxu1 %v2796_v10  ;;  %2513 = vmatprep.subr.bf16.mxu0 %v2714_v0 }
 0xb70   :  { %2522 = vmatprep.subr.bf16.mxu1 %v2714_v0 }
 0xb72   :  { %2515 = vmatpush3.bf16.msra.mxu0 %v2860_v42 }
 0xb73   :  { %2534 = vmatprep.subr.bf16.mxu0 %v2714_v0 }
 0xc38   :  { %v1062_v3 = vpop.f32.mrb[6].mxu0 }
 0xc39   :  { %v1066_v5 = vadd.f32 %v1062_v3, %v2814_v13  ;;  %v2316_v6 = vpop.f32.mrb[7].mxu0 }
 0xc3b   :  { %v2007_v7 = vmul.f32 -1.442695, %v1066_v5 }
 0xc3d   :  { %2660 = vpow2.f32 %v2007_v7  ;;  %v963_v11 = vpop.f32.mrb[10].mxu1 }
 0xc3e   :  { %v964_v12 = vadd.f32 %v2893_v48, %v963_v11  ;;  %v2305_v14 = vpop.f32.mrb[11].mxu1 }
 0xc40   :  { %v2004_v16 = vmul.f32 -1.442695, %v964_v12 }
 0xc42   :  { %2662 = vpow2.f32 %v2004_v16 }
 0xc47   :  { %v2661_v17 = vpop.eup %2660 }
 0xc48   :  { %v1070_v18 = vadd.f32 1.0, %v2661_v17 }
 0xc4a   :  { %2664 = vrcp.f32 %v1070_v18 }
 0xc4c   :  { %v2663_v19 = vpop.eup %2662 }
 0xc4d   :  { %v970_v20 = vadd.f32 1.0, %v2663_v19 }
 0xc4f   :  { %2666 = vrcp.f32 %v970_v20 }
 0xc54   :  { %v2665_v21 = vpop.eup %2664 }
 0xc55   :  { %v1073_v22 = vmul.f32 2.0, %v2665_v21  ;;  %v1078_v34 = vmul.f32 %v2665_v21, %v1076_v32 }
 0xc57   :  { %v2008_v23 = vadd.f32 -1.0, %v1073_v22 }
 0xc59   :  { %v2667_v24 = vpop.eup %2666  ;;  %1080 = vrot.lane.b32.xlu0 %v2008_v23, %s2717_s18 }
 0xc5a   :  { %v973_v25 = vmul.f32 2.0, %v2667_v24  ;;  %v975_v39 = vmul.f32 %v2667_v24, %v2983_v54 }
 0xc5c   :  { %v2005_v26 = vadd.f32 -1.0, %v973_v25 }
 0xc5e   :  { %977 = vrot.lane.b32.xlu1 %v2005_v26, %s2717_s18 }
 0xccb   :  { %v1081_v27 = vpop.permute.xlu0 %1080 }
 0xccc   :  { %v1083_v29 = vmul.f32 %v2665_v21, %v1081_v27 }
 0xcce   :  { %1085 = vrot.lane.b32.xlu0 %v1083_v29, %s2718_s3 }
 0xcd0   :  { %v978_v30 = vpop.permute.xlu1 %977 }
 0xcd1   :  { %v980_v31 = vmul.f32 %v2667_v24, %v978_v30 }
 0xcd3   :  { %982 = vrot.lane.b32.xlu1 %v980_v31, %s2718_s3 }
 0xd40   :  { %v1086_v36 = vpop.permute.xlu0 %1085 }
 0xd41   :  { %v3020_v37 = vadd.f32 %v1086_v36, %v1078_v34 }
 0xd43   :  { %2668 = vtanh.f32 %v3020_v37  ;;  %v1289_v20 = vrot.slane %v3020_v37, 6 }
 0xd45   :  { %v983_v40 = vpop.permute.xlu1 %982 }
 0xd46   :  { %v3024_v41 = vadd.f32 %v983_v40, %v975_v39 }
 0xd48   :  { %2670 = vtanh.f32 %v3024_v41 }
 0xd4d   :  { %v2669_v15 = vpop.eup %2668 }
 0xd4e   :  { %1091 = vrot.lane.b32.xlu0 %v2669_v15, %s2717_s18 }
 0xd52   :  { %v2671_v43 = vpop.eup %2670 }
 0xd53   :  { %988 = vrot.lane.b32.xlu1 %v2671_v43, %s2717_s18 }
 0xdc0   :  { %v1092_v44 = vpop.permute.xlu0 %1091 }
 0xdc1   :  { %v1094_v45 = vmul.f32 %v2665_v21, %v1092_v44 }
 0xdc3   :  { %1202 = vrot.lane.b32.xlu0 %v1094_v45, %s2718_s3 }
 0xdc5   :  { %v989_v46 = vpop.permute.xlu1 %988 }
 0xdc6   :  { %v3030_v47 = vmul.f32 %v2667_v24, %v989_v46 }
 0xdc7   :  { %1100 = vrot.lane.b32.xlu0 %v1094_v45, %s2717_s18 }
 0xdc8   :  { %1096 = vrot.lane.b32.xlu1 %v3030_v47, %s2718_s3 }
 0xe35   :  { %v1203_v49 = vpop.permute.xlu0 %1202 }
 0xe36   :  { %2345 = vmatmul.mubr.msk.f32.vlgmr.msra.gmra.mrb[12].mxu1 %vm140_vm3, %v1203_v49 }
 0xe37   :  { %2524 = vmatpush3.bf16.msra.mxu1 %v2833_v33  ;;  %2363 = vmatprep.mubr.msk.f32.mxu1 %vm2715_vm2, %v2716_v8 }
 0xe38   :  { %2525 = vmatprep.subr.bf16.mxu1 %v2714_v0 }
 0xe39   :  { %v1101_v50 = vpop.permute.xlu0 %1100 }
 0xe3a   :  { %v1097_v51 = vpop.permute.xlu1 %1096 }
 0xe3b   :  { %v1103_v52 = vsel %vm140_vm3, %v1097_v51, %v1101_v50  ;;  %2527 = vmatpush3.bf16.msra.mxu1 %v2839_v35 }
 0xe3c   :  { %2334 = vmatmul.mubr.msk.f32.vlgmr.msra.gmra.mrb[8].mxu0 %vm251_vm4, %v1103_v52  ;;  %2528 = vmatprep.subr.bf16.mxu1 %v2714_v0 }
 0xe3d   :  { %2536 = vmatpush3.bf16.msra.mxu0 %v2775_v4  ;;  %2374 = vmatprep.mubr.msk.f32.mxu0 %vm2715_vm2, %v2716_v8 }
 0xe3e   :  { %2537 = vmatprep.subr.bf16.mxu0 %v2714_v0 }
 0xe3f   :  { %2530 = vmatpush3.bf16.msra.mxu1 %v2849_v38 }
 0xe40   :  { %2531 = vmatprep.subr.bf16.mxu1 %v2714_v0 }
 0xe41   :  { %2539 = vmatpush3.bf16.msra.mxu0 %v2796_v10 }
 0xe42   :  { %2540 = vmatprep.subr.bf16.mxu0 %v2714_v0 }
 0xe43   :  { %2533 = vmatpush3.bf16.msra.mxu1 %v2860_v42 }
 0xe44   :  { %2552 = vmatprep.subr.bf16.mxu1 %v2714_v0 }
 0xf09   :  { %v1272_v53 = vpop.f32.mrb[12].mxu1 }
 0xf0a   :  { %v1277_v54 = vrot.slane %v1272_v53, 6  ;;  %v2346_v55 = vpop.f32.mrb[13].mxu1 }
 0xf0c   :  { %v1279_v56 = vadd.f32 %v1277_v54, %v2814_v13 }
 0xf0e   :  { %v2013_v57 = vmul.f32 -1.442695, %v1279_v56 }
 0xf0f   :  { %v1173_v58 = vpop.f32.mrb[8].mxu0 }
 0xf10   :  { %2672 = vpow2.f32 %v2013_v57  ;;  %v1174_v59 = vadd.f32 %v2893_v48, %v1173_v58  ;;  %v2335_v60 = vpop.f32.mrb[9].mxu0 }
 0xf12   :  { %v2010_v62 = vmul.f32 -1.442695, %v1174_v59 }
 0xf14   :  { %2674 = vpow2.f32 %v2010_v62 }
 0xf1a   :  { %v2673_v63 = vpop.eup %2672 }
 0xf1b   :  { %v1283_v1 = vadd.f32 1.0, %v2673_v63 }
 0xf1d   :  { %2676 = vrcp.f32 %v1283_v1 }
 0xf1e   :  { %v2675_v2 = vpop.eup %2674 }
 0xf1f   :  { %v1180_v3 = vadd.f32 1.0, %v2675_v2 }
 0xf21   :  { %2678 = vrcp.f32 %v1180_v3 }
 0xf27   :  { %v2677_v5 = vpop.eup %2676 }
 0xf28   :  { %v1286_v6 = vmul.f32 2.0, %v2677_v5  ;;  %v1291_v21 = vmul.f32 %v2677_v5, %v1289_v20 }
 0xf2a   :  { %v2014_v7 = vadd.f32 -1.0, %v1286_v6 }
 0xf2b   :  { %v2679_v11 = vpop.eup %2678 }
 0xf2c   :  { %1293 = vrot.lane.b32.xlu1 %v2014_v7, %s2717_s18  ;;  %v1183_v12 = vmul.f32 2.0, %v2679_v11  ;;  %v1185_v24 = vmul.f32 %v2679_v11, %v3024_v41 }
 0xf2e   :  { %v2011_v14 = vadd.f32 -1.0, %v1183_v12 }
 0xf30   :  { %1187 = vrot.lane.b32.xlu0 %v2011_v14, %s2717_s18 }
 0xf9e   :  { %v1294_v16 = vpop.permute.xlu1 %1293 }
 0xf9f   :  { %v1296_v17 = vmul.f32 %v2677_v5, %v1294_v16 }
 0xfa1   :  { %1298 = vrot.lane.b32.xlu1 %v1296_v17, %s2718_s3 }
 0xfa2   :  { %v1188_v18 = vpop.permute.xlu0 %1187 }
 0xfa3   :  { %v1190_v19 = vmul.f32 %v2679_v11, %v1188_v18 }
 0xfa5   :  { %1192 = vrot.lane.b32.xlu0 %v1190_v19, %s2718_s3 }
0x1013   :  { %v1299_v22 = vpop.permute.xlu1 %1298 }
0x1014   :  { %v3061_v23 = vadd.f32 %v1299_v22, %v1291_v21 }
0x1016   :  { %2680 = vtanh.f32 %v3061_v23  ;;  %v1503_v3 = vrot.slane %v3061_v23, 6 }
0x1017   :  { %v1193_v25 = vpop.permute.xlu0 %1192 }
0x1018   :  { %v3065_v26 = vadd.f32 %v1193_v25, %v1185_v24 }
0x101a   :  { %2682 = vtanh.f32 %v3065_v26 }
0x1020   :  { %v2681_v27 = vpop.eup %2680 }
0x1021   :  { %1304 = vrot.lane.b32.xlu1 %v2681_v27, %s2717_s18 }
0x1024   :  { %v2683_v29 = vpop.eup %2682 }
0x1025   :  { %1198 = vrot.lane.b32.xlu0 %v2683_v29, %s2717_s18 }
0x1093   :  { %v1305_v30 = vpop.permute.xlu1 %1304 }
0x1094   :  { %v1307_v31 = vmul.f32 %v2677_v5, %v1305_v30 }
0x1096   :  { %v1313_v32 = vrot.slane %v1307_v31, 2 }
0x1097   :  { %v1199_v34 = vpop.permute.xlu0 %1198 }
0x1098   :  { %v1201_v36 = vmul.f32 %v2679_v11, %v1199_v34  ;;  %1416 = vrot.lane.b32.xlu1 %v1313_v32, %s2718_s3 }
0x109a   :  { %1309 = vrot.lane.b32.xlu0 %v1201_v36, %s2718_s3 }
0x109c   :  { %1314 = vrot.lane.b32.xlu1 %v1313_v32, %s2717_s18 }
0x110a   :  { %v1417_v37 = vpop.permute.xlu1 %1416 }
0x110b   :  { %2375 = vmatmul.mubr.msk.f32.vlgmr.msra.gmra.mrb[10].mxu0 %vm140_vm3, %v1417_v37 }
0x110c   :  { %2542 = vmatpush3.bf16.msra.mxu0 %v2833_v33  ;;  %2393 = vmatprep.mubr.msk.f32.mxu0 %vm2715_vm2, %v2716_v8  ;;  %v3078_v39 = vpop.permute.xlu0 %1309 }
0x110d   :  { %2543 = vmatprep.subr.bf16.mxu0 %v2714_v0 }
0x110e   :  { %v1315_v40 = vpop.permute.xlu1 %1314 }
0x110f   :  { %v1317_v41 = vsel %vm140_vm3, %v3078_v39, %v1315_v40 }
0x1110   :  { %2364 = vmatmul.mubr.msk.f32.vlgmr.msra.gmra.mrb[14].mxu1 %vm251_vm4, %v1317_v41  ;;  %2545 = vmatpush3.bf16.msra.mxu0 %v2839_v35 }
0x1111   :  { %2554 = vmatpush3.bf16.msra.mxu1 %v2775_v4  ;;  %2546 = vmatprep.subr.bf16.mxu0 %v2714_v0 }
0x1112   :  { %2555 = vmatprep.subr.bf16.mxu1 %v2714_v0  ;;  %2404 = vmatprep.mubr.msk.f32.mxu1 %vm2715_vm2, %v2716_v8 }
0x1114   :  { %2548 = vmatpush3.bf16.msra.mxu0 %v2849_v38 }
0x1115   :  { %2557 = vmatpush3.bf16.msra.mxu1 %v2796_v10  ;;  %2549 = vmatprep.subr.bf16.mxu0 %v2714_v0 }
0x1116   :  { %2558 = vmatprep.subr.bf16.mxu1 %v2714_v0 }
0x1118   :  { %2551 = vmatpush3.bf16.msra.mxu0 %v2860_v42 }
0x11de   :  { %v1486_v15 = vpop.f32.mrb[10].mxu0 }
0x11df   :  { %v1491_v43 = vrot.slane %v1486_v15, 4  ;;  %v2376_v4 = vpop.f32.mrb[11].mxu0 }
0x11e1   :  { %v1493_v44 = vadd.f32 %v1491_v43, %v2814_v13 }
0x11e3   :  { %v2019_v45 = vmul.f32 -1.442695, %v1493_v44  ;;  %v1387_v46 = vpop.f32.mrb[14].mxu1 }
0x11e4   :  { %v1388_v49 = vadd.f32 %v2893_v48, %v1387_v46  ;;  %v2365_v50 = vpop.f32.mrb[15].mxu1 }
0x11e5   :  { %2684 = vpow2.f32 %v2019_v45 }
0x11e6   :  { %v2016_v51 = vmul.f32 -1.442695, %v1388_v49 }
0x11e8   :  { %2686 = vpow2.f32 %v2016_v51 }
0x11ef   :  { %v2685_v10 = vpop.eup %2684 }
0x11f0   :  { %v1497_v52 = vadd.f32 1.0, %v2685_v10 }
0x11f2   :  { %v2687_v53 = vpop.eup %2686  ;;  %2688 = vrcp.f32 %v1497_v52 }
0x11f3   :  { %v1394_v54 = vadd.f32 1.0, %v2687_v53 }
0x11f5   :  { %2690 = vrcp.f32 %v1394_v54 }
0x11fc   :  { %v2689_v55 = vpop.eup %2688 }
0x11fd   :  { %v1500_v56 = vmul.f32 2.0, %v2689_v55  ;;  %v1505_v5 = vmul.f32 %v2689_v55, %v1503_v3 }
0x11ff   :  { %v2691_v57 = vpop.eup %2690  ;;  %v2020_v58 = vadd.f32 -1.0, %v1500_v56 }
0x1200   :  { %v1397_v59 = vmul.f32 2.0, %v2691_v57  ;;  %v1399_v11 = vmul.f32 %v2691_v57, %v3065_v26 }
0x1201   :  { %1507 = vrot.lane.b32.xlu0 %v2020_v58, %s2717_s18 }
0x1202   :  { %v2017_v60 = vadd.f32 -1.0, %v1397_v59 }
0x1204   :  { %1401 = vrot.lane.b32.xlu1 %v2017_v60, %s2717_s18 }
0x1273   :  { %v1508_v62 = vpop.permute.xlu0 %1507 }
0x1274   :  { %v1510_v63 = vmul.f32 %v2689_v55, %v1508_v62 }
0x1276   :  { %1512 = vrot.lane.b32.xlu0 %v1510_v63, %s2718_s3  ;;  %v1402_v1 = vpop.permute.xlu1 %1401 }
0x1277   :  { %v1404_v2 = vmul.f32 %v2691_v57, %v1402_v1 }
0x1279   :  { %1406 = vrot.lane.b32.xlu1 %v1404_v2, %s2718_s3 }
0x12e8   :  { %v1513_v6 = vpop.permute.xlu0 %1512 }
0x12e9   :  { %v3101_v7 = vadd.f32 %v1513_v6, %v1505_v5 }
0x12eb   :  { %2692 = vtanh.f32 %v3101_v7  ;;  %v1407_v12 = vpop.permute.xlu1 %1406  ;;  %v1717_v49 = vrot.slane %v3101_v7, 6 }
0x12ec   :  { %v3105_v14 = vadd.f32 %v1407_v12, %v1399_v11 }
0x12ee   :  { %2694 = vtanh.f32 %v3105_v14 }
0x12f5   :  { %v2693_v16 = vpop.eup %2692 }
0x12f6   :  { %1518 = vrot.lane.b32.xlu0 %v2693_v16, %s2717_s18 }
0x12f8   :  { %v2695_v17 = vpop.eup %2694 }
0x12f9   :  { %1412 = vrot.lane.b32.xlu1 %v2695_v17, %s2717_s18 }
0x1368   :  { %v1519_v18 = vpop.permute.xlu0 %1518 }
0x1369   :  { %v1521_v19 = vmul.f32 %v2689_v55, %v1519_v18 }
0x136b   :  { %v1527_v20 = vrot.slane %v1521_v19, 4  ;;  %v1413_v21 = vpop.permute.xlu1 %1412 }
0x136c   :  { %v3110_v22 = vmul.f32 %v2691_v57, %v1413_v21  ;;  %v1880_v21 = vld [vmem:[%s3279_s6 + $0x88] sm:$0xff] }
0x136d   :  { %1630 = vrot.lane.b32.xlu0 %v1527_v20, %s2718_s3 }
0x136e   :  { %1523 = vrot.lane.b32.xlu1 %v3110_v22, %s2718_s3 }
0x1371   :  { %1528 = vrot.lane.b32.xlu0 %v1527_v20, %s2717_s18  ;;  %v1879_v20 = vld [vmem:[%s3279_s6 + $0x80] sm:$0xff] }
0x13df   :  { %v1631_v23 = vpop.permute.xlu0 %1630 }
0x13e0   :  { %2405 = vmatmul.mubr.msk.f32.vlgmr.msra.gmra.mrb[16].mxu1 %vm140_vm3, %v1631_v23  ;;  %v1524_v24 = vpop.permute.xlu1 %1523  ;;  %v1863_v23 = vld [vmem:[%s3279_s6] sm:$0xff] }
0x13e1   :  { %2560 = vmatpush3.bf16.msra.mxu1 %v2833_v33  ;;  %2423 = vmatprep.mubr.msk.f32.mxu1 %vm2715_vm2, %v2716_v8 }
0x13e2   :  { %2561 = vmatprep.subr.bf16.mxu1 %v2714_v0 }
0x13e3   :  { %v1529_v25 = vpop.permute.xlu0 %1528 }
0x13e4   :  { %v1531_v26 = vsel %vm140_vm3, %v1524_v24, %v1529_v25  ;;  %v2570_v24 = vpack.c.bf16 %v1880_v21, %v1879_v20  ;;  %v1864_v25 = vld [vmem:[%s3279_s6 + $0x8] sm:$0xff] }
0x13e5   :  { %2394 = vmatmul.mubr.msk.f32.vlgmr.msra.gmra.mrb[12].mxu0 %vm251_vm4, %v1531_v26  ;;  %2563 = vmatpush3.bf16.msra.mxu1 %v2839_v35  ;;  %v2572_v26 = vpack.c.bf16 %v1864_v25, %v1863_v23 }
0x13e6   :  { %2564 = vmatprep.subr.bf16.mxu1 %v2714_v0  ;;  %2571 = vmatprep.subr.bf16.mxu0 %v2570_v24 }
0x13e7   :  { %2573 = vmatpush3.bf16.msra.mxu0 %v2572_v26  ;;  %v13_v26 = vstv %s3280_s7 }
0x13e8   :  { %14 = vst [vmem:[#allocation2] sm:$0x1] %v13_v26 }
0x13e9   :  { %2566 = vmatpush3.bf16.msra.mxu1 %v2849_v38 }
0x13ea   :  { %2567 = vmatprep.subr.bf16.mxu1 %v2714_v0 }
0x13ed   :  { %2569 = vmatpush3.bf16.msra.mxu1 %v2860_v42 }
0x14b3   :  { %v1700_v33 = vpop.f32.mrb[16].mxu1 }
0x14b4   :  { %v1705_v8 = vrot.slane %v1700_v33, 2  ;;  %v2406_v27 = vpop.f32.mrb[17].mxu1 }
0x14b5   :  { %v1866_v27 = vld [vmem:[%s3279_s6 + $0x18] sm:$0xff] }
0x14b6   :  { %v1707_v29 = vadd.f32 %v1705_v8, %v2814_v13  ;;  %v1865_v8 = vld [vmem:[%s3279_s6 + $0x10] sm:$0xff] }
0x14b8   :  { %v2025_v30 = vmul.f32 -1.442695, %v1707_v29  ;;  %v1601_v31 = vpop.f32.mrb[12].mxu0  ;;  %v1883_v29 = vld [vmem:[%s3279_s6 + $0xa0] sm:$0xff] }
0x14b9   :  { %v1602_v32 = vadd.f32 %v2893_v48, %v1601_v31  ;;  %v2395_v34 = vpop.f32.mrb[13].mxu0  ;;  %v2576_v31 = vpack.c.bf16 %v1866_v27, %v1865_v8 }
0x14ba   :  { %2696 = vpow2.f32 %v2025_v30  ;;  %v1884_v30 = vld [vmem:[%s3279_s6 + $0xa8] sm:$0xff]  ;;  %v1867_v34 = vld [vmem:[%s3279_s6 + $0x20] sm:$0xff] }
0x14bb   :  { %v2022_v35 = vmul.f32 -1.442695, %v1602_v32  ;;  %v2578_v32 = vpack.c.bf16 %v1884_v30, %v1883_v29 }
0x14bd   :  { %2698 = vpow2.f32 %v2022_v35  ;;  %v1868_v35 = vld [vmem:[%s3279_s6 + $0x28] sm:$0xff] }
0x14c4   :  { %v2697_v36 = vpop.eup %2696 }
0x14c5   :  { %v1711_v37 = vadd.f32 1.0, %v2697_v36  ;;  %v1885_v36 = vld [vmem:[%s3279_s6 + $0xb0] sm:$0xff] }
0x14c7   :  { %v2699_v38 = vpop.eup %2698  ;;  %2700 = vrcp.f32 %v1711_v37  ;;  %v1886_v37 = vld [vmem:[%s3279_s6 + $0xb8] sm:$0xff] }
0x14c8   :  { %v1608_v0 = vadd.f32 1.0, %v2699_v38  ;;  %v2580_v38 = vpack.c.bf16 %v1868_v35, %v1867_v34 }
0x14ca   :  { %2702 = vrcp.f32 %v1608_v0  ;;  %v2582_v0 = vpack.c.bf16 %v1886_v37, %v1885_v36 }
0x14d1   :  { %v2701_v42 = vpop.eup %2700 }
0x14d2   :  { %v1714_v40 = vmul.f32 2.0, %v2701_v42  ;;  %v1719_v50 = vmul.f32 %v2701_v42, %v1717_v49 }
0x14d4   :  { %v2703_v41 = vpop.eup %2702  ;;  %v2026_v15 = vadd.f32 -1.0, %v1714_v40  ;;  %v1870_v40 = vld [vmem:[%s3279_s6 + $0x38] sm:$0xff] }
0x14d5   :  { %v1611_v43 = vmul.f32 2.0, %v2703_v41  ;;  %v1613_v52 = vmul.f32 %v2703_v41, %v3105_v14 }
0x14d6   :  { %1721 = vrot.lane.b32.xlu1 %v2026_v15, %s2717_s18  ;;  %v1888_v15 = vld [vmem:[%s3279_s6 + $0xc8] sm:$0xff] }
0x14d7   :  { %v2023_v13 = vadd.f32 -1.0, %v1611_v43 }
0x14d9   :  { %1615 = vrot.lane.b32.xlu0 %v2023_v13, %s2717_s18 }
0x1548   :  { %v1722_v4 = vpop.permute.xlu1 %1721 }
0x1549   :  { %v1724_v44 = vmul.f32 %v2701_v42, %v1722_v4  ;;  %v1871_v4 = vld [vmem:[%s3279_s6 + $0x40] sm:$0xff] }
0x154b   :  { %v1616_v45 = vpop.permute.xlu0 %1615  ;;  %1726 = vrot.lane.b32.xlu1 %v1724_v44, %s2718_s3  ;;  %v1872_v44 = vld [vmem:[%s3279_s6 + $0x48] sm:$0xff] }
0x154c   :  { %v1618_v46 = vmul.f32 %v2703_v41, %v1616_v45  ;;  %v1889_v45 = vld [vmem:[%s3279_s6 + $0xd0] sm:$0xff]  ;;  %v2588_v49 = vpack.c.bf16 %v1872_v44, %v1871_v4 }
0x154e   :  { %1620 = vrot.lane.b32.xlu0 %v1618_v46, %s2718_s3  ;;  %v1890_v46 = vld [vmem:[%s3279_s6 + $0xd8] sm:$0xff] }
0x15bd   :  { %v1727_v51 = vpop.permute.xlu1 %1726 }
0x15be   :  { %v1729_v10 = vadd.f32 %v1727_v51, %v1719_v50  ;;  %v2590_v50 = vpack.c.bf16 %v1890_v46, %v1889_v45  ;;  %v1873_v51 = vld [vmem:[%s3279_s6 + $0x50] sm:$0xff] }
0x15c0   :  { %2704 = vtanh.f32 %v1729_v10  ;;  %v1621_v53 = vpop.permute.xlu0 %1620  ;;  %v1874_v10 = vld [vmem:[%s3279_s6 + $0x58] sm:$0xff] }
0x15c1   :  { %v3136_v54 = vadd.f32 %v1621_v53, %v1613_v52  ;;  %v2592_v52 = vpack.c.bf16 %v1874_v10, %v1873_v51 }
0x15c3   :  { %2706 = vtanh.f32 %v3136_v54 }
0x15ca   :  { %v2705_v55 = vpop.eup %2704 }
0x15cb   :  { %1732 = vrot.lane.b32.xlu1 %v2705_v55, %s2717_s18  ;;  %v1891_v55 = vld [vmem:[%s3279_s6 + $0xe0] sm:$0xff] }
0x15cd   :  { %v2707_v56 = vpop.eup %2706 }
0x15ce   :  { %1626 = vrot.lane.b32.xlu0 %v2707_v56, %s2717_s18  ;;  %v1892_v56 = vld [vmem:[%s3279_s6 + $0xe8] sm:$0xff] }
0x163d   :  { %v1733_v57 = vpop.permute.xlu1 %1732 }
0x163e   :  { %v1735_v58 = vmul.f32 %v2701_v42, %v1733_v57  ;;  %v1869_v42 = vld [vmem:[%s3279_s6 + $0x30] sm:$0xff] }
0x163f   :  { %v2584_v43 = vpack.c.bf16 %v1870_v40, %v1869_v42 }
0x1640   :  { %v1741_v59 = vrot.slane %v1735_v58, 6  ;;  %v1627_v60 = vpop.permute.xlu0 %1626  ;;  %v2594_v58 = vpack.c.bf16 %v1892_v56, %v1891_v55 }
0x1641   :  { %v3141_v62 = vmul.f32 %v2703_v41, %v1627_v60  ;;  %v1887_v41 = vld [vmem:[%s3279_s6 + $0xc0] sm:$0xff]  ;;  %v1876_v60 = vld [vmem:[%s3279_s6 + $0x68] sm:$0xff] }
0x1642   :  { %1742 = vrot.lane.b32.xlu0 %v1741_v59, %s2717_s18  ;;  %v2586_v13 = vpack.c.bf16 %v1888_v15, %v1887_v41  ;;  %v1875_v59 = vld [vmem:[%s3279_s6 + $0x60] sm:$0xff] }
0x1643   :  { %1737 = vrot.lane.b32.xlu1 %v3141_v62, %s2718_s3 }
0x16b4   :  { %v1743_v63 = vpop.permute.xlu0 %1742 }
0x16b5   :  { %v1738_v1 = vpop.permute.xlu1 %1737 }
0x16b6   :  { %v1745_v2 = vsel %vm140_vm3, %v1738_v1, %v1743_v63  ;;  %v1893_v1 = vld [vmem:[%s3279_s6 + $0xf0] sm:$0xff] }
0x16b7   :  { %2424 = vmatmul.mubr.msk.f32.vlgmr.msra.gmra.mrb[18].mxu1 %vm251_vm4, %v1745_v2  ;;  %v1894_v2 = vld [vmem:[%s3279_s6 + $0xf8] sm:$0xff] }
0x178a   :  { %v1815_v3 = vpop.f32.mrb[18].mxu1 }
0x178b   :  { %v1816_v5 = vadd.f32 %v2893_v48, %v1815_v3  ;;  %v2425_v6 = vpop.f32.mrb[19].mxu1  ;;  %v2608_v48 = vpack.i.bf16 %v2947_v9, %v3110_v22  ;;  %v1881_v9 = vld [vmem:[%s3279_s6 + $0x90] sm:$0xff]  ;;  %v1882_v22 = vld [vmem:[%s3279_s6 + $0x98] sm:$0xff]  ;;  %v2598_v3 = vpack.c.bf16 %v1894_v2, %v1893_v1 }
0x178c   :  { %v2574_v33 = vpack.c.bf16 %v1882_v22, %v1881_v9  ;;  %v1878_v6 = vld [vmem:[%s3279_s6 + $0x78] sm:$0xff] }
0x178d   :  { %v2028_v7 = vmul.f32 -1.442695, %v1816_v5  ;;  %v1877_v5 = vld [vmem:[%s3279_s6 + $0x70] sm:$0xff] }
0x178e   :  { %2575 = vmatprep.subr.bf16.mxu0 %v2574_v33  ;;  %v2030_v33 = vld [vmem:[#allocation2] ss:$0 sm:$0xff] }
0x178f   :  { %2708 = vpow2.f32 %v2028_v7  ;;  %2577 = vmatpush3.bf16.msra.mxu0 %v2576_v31  ;;  %v2600_v7 = vpack.c.bf16 %v1878_v6, %v1877_v5 }
0x1790   :  { %2579 = vmatprep.subr.bf16.mxu0 %v2578_v32 }
0x1793   :  { %2581 = vmatpush3.bf16.msra.mxu0 %v2580_v38 }
0x1794   :  { %2583 = vmatprep.subr.bf16.mxu0 %v2582_v0 }
0x1797   :  { %2585 = vmatpush3.bf16.msra.mxu0 %v2584_v43 }
0x1798   :  { %2587 = vmatprep.subr.bf16.mxu0 %v2586_v13 }
0x1799   :  { %v2709_v11 = vpop.eup %2708 }
0x179a   :  { %v1822_v12 = vadd.f32 1.0, %v2709_v11 }
0x179b   :  { %2589 = vmatpush3.bf16.msra.mxu0 %v2588_v49 }
0x179c   :  { %2710 = vrcp.f32 %v1822_v12  ;;  %2591 = vmatprep.subr.bf16.mxu0 %v2590_v50  ;;  %v2613_v12 = vpack.i.bf16 %v2988_v61, %v3141_v62 }
0x179f   :  { %2593 = vmatpush3.bf16.msra.mxu0 %v2592_v52 }
0x17a0   :  { %2595 = vmatprep.subr.bf16.mxu0 %v2594_v58 }
0x17a6   :  { %v3149_v14 = vpop.eup %2710 }
0x17a7   :  { %v1825_v16 = vmul.f32 2.0, %v3149_v14  ;;  %v1827_v53 = vmul.f32 %v3149_v14, %v3136_v54  ;;  %v2596_v54 = vpack.c.bf16 %v1876_v60, %v1875_v59 }
0x17a9   :  { %v2029_v17 = vadd.f32 -1.0, %v1825_v16  ;;  %2597 = vmatpush3.bf16.msra.mxu0 %v2596_v54 }
0x17aa   :  { %2599 = vmatprep.subr.bf16.mxu0 %v2598_v3 }
0x17ab   :  { %1829 = vrot.lane.b32.xlu1 %v2029_v17, %s2717_s18 }
0x17ad   :  { %2601 = vmatpush3.bf16.msra.mxu0 %v2600_v7 }
0x181d   :  { %v1830_v18 = vpop.permute.xlu1 %1829 }
0x181e   :  { %v1832_v19 = vmul.f32 %v3149_v14, %v1830_v18 }
0x1820   :  { %1834 = vrot.lane.b32.xlu0 %v1832_v19, %s2718_s3 }
0x1824   :  { %2609 = vrot.lane.b32.xlu0 %v2608_v48, %s2717_s18 }
0x1892   :  { %v1835_v57 = vpop.permute.xlu0 %1834 }
0x1893   :  { %v1837_v63 = vadd.f32 %v1835_v57, %v1827_v53 }
0x1895   :  { %2712 = vtanh.f32 %v1837_v63 }
0x1896   :  { %v2610_v16 = vpop.permute.xlu0 %2609 }
0x1897   :  { %v2612_v18 = vunpack.i.h.bf16 %v2610_v16  ;;  %v2611_v19 = vunpack.i.l.bf16 %v2610_v16 }
0x1899   :  { %v1856_v23 = vsel %vm140_vm3, %v2913_v28, %v2612_v18  ;;  %v1860_v24 = vsel %vm140_vm3, %v3078_v39, %v2611_v19 }
0x189f   :  { %v2713_v11 = vpop.eup %2712 }
0x18a0   :  { %1840 = vrot.lane.b32.xlu1 %v2713_v11, %s2717_s18 }
0x18a4   :  { %2614 = vrot.lane.b32.xlu1 %v2613_v12, %s2719_s20 }
0x1912   :  { %v1841_v17 = vpop.permute.xlu1 %1840 }
0x1913   :  { %v1843_v25 = vmul.f32 %v3149_v14, %v1841_v17 }
0x1916   :  { %v2615_v48 = vpop.permute.xlu1 %2614 }
0x1917   :  { %v2617_v20 = vunpack.i.h.bf16 %v2615_v48  ;;  %v2616_v21 = vunpack.i.l.bf16 %v2615_v48 }
0x1919   :  { %v1857_v61 = vsel %vm251_vm4, %v1856_v23, %v2617_v20  ;;  %v1861_v62 = vsel %vm251_vm4, %v1860_v24, %v2616_v21 }
0x191a   :  { %v1862_v9 = vsel %vm1858_vm5, %v1861_v62, %v1843_v25  ;;  %v1859_v22 = vsel %vm1858_vm5, %v1857_v61, %v3030_v47 }
0x191b   :  { %1966 = vmatprep.mubr.f32.mxu0 %v1862_v9 }
0x191c   :  { %1967 = vmatmul.mubr.f32.vlgmr.msra.gmra.mrb[14].mxu0 %v1859_v22 }
0x19ef   :  { %v2178_v28 = vpop.f32.mrb[14].mxu0 }
0x19f0   :  { %v2179_v8 = vpop.f32.mrb[15].mxu0 }
0x19f1   :  { %v2180_v39 = vadd.f32 %v2179_v8, %v2178_v28 }
0x19f3   :  { %v1969_v14 = vadd.f32 %v2180_v39, %v2030_v33 }
0x19f5   :  { %1973 = vst.msk [vmem:[%s3281_s8] sm:$0x3] %vm1972_vm6, %v1969_v14 }

</bundles_post_ra>
